<compile_context>
chip_gen: v7x
topology: tpu7x:2x2x1
jax: 0.10.0
libtpu: 0.0.40
codegen_flags: <defaults>
</compile_context>

<pallas_src>
import functools

import jax
import jax.numpy as jnp
from jax.experimental import pallas as pl
from jax.experimental.pallas import tpu as pltpu

LN_EPS = 1e-5  # torch.nn.LayerNorm default


# --------------------------------------------------------------------------
# Kernel
# --------------------------------------------------------------------------
def _im2text_kernel(x_ref, w_ref, beff_ref, g_ref, o_ref, ln_ref, *, tn, eps):
    # x_ref:   (tm, D)  input rows (full feature dim, lane axis)
    # w_ref:   (D, tn)  bf16 weight tile (already W^T)
    # beff_ref:(1, tn)  f32 fused bias  (b + beta @ W^T)
    # g_ref:   (1, D)   f32 LN gamma
    # o_ref:   (tm, tn) output tile
    # ln_ref:  (tm, D)  bf16 VMEM scratch holding the LN result for this row tile
    j = pl.program_id(1)

    # LayerNorm once per row tile (j == 0), cached across the N axis.
    # One-pass mean / variance: sum(x) and sum(x*x) reduce independently.
    @pl.when(j == 0)
    def _():
        xf = x_ref[...].astype(jnp.float32)
        inv_d = 1.0 / xf.shape[-1]
        s1 = jnp.sum(xf, axis=-1, keepdims=True)
        s2 = jnp.sum(xf * xf, axis=-1, keepdims=True)
        mean = s1 * inv_d
        var = jnp.maximum(s2 * inv_d - mean * mean, 0.0)
        # gamma fused into the rsqrt scale; beta is folded into b_eff on host.
        scale = jax.lax.rsqrt(var + eps) * g_ref[...]
        ln_ref[...] = ((xf - mean) * scale).astype(ln_ref.dtype)

    # Linear on the MXU: bf16 inputs, f32 accumulation.
    y = jnp.dot(ln_ref[...], w_ref[...], preferred_element_type=jnp.float32)

    # Residual + fused bias. Re-read the x tile here (after the dot) so no
    # (tm, D) f32 temporary is live across the MXU call.
    col = pl.multiple_of(j * tn, tn)
    xs = x_ref[:, pl.ds(col, tn)].astype(jnp.float32)
    o_ref[...] = (xs + y + beff_ref[...]).astype(o_ref.dtype)


# --------------------------------------------------------------------------
# One-time parameter prep (hoisted out of the per-call path)
# --------------------------------------------------------------------------
def im2text_prepare_params(w, b, gamma, beta):
    """w: (D_out, D_in) torch-layout Linear.weight; returns kernel params.

    Returns (w_t_bf16 (D_in, D_out), b_eff (1, D_out) f32, gamma (1, D) f32).
    beta is folded through the weight: LN(x)@W = (centered*scale)@W + beta@W.
    """
    w_t = jnp.asarray(w, jnp.float32).T                      # (D_in, D_out)
    b_eff = jnp.asarray(b, jnp.float32) + jnp.asarray(beta, jnp.float32) @ w_t
    return (w_t.astype(jnp.bfloat16),
            b_eff.reshape(1, -1),
            jnp.asarray(gamma, jnp.float32).reshape(1, -1))


# --------------------------------------------------------------------------
# Forward wrapper
# --------------------------------------------------------------------------
def im2text_forward(x, w_bf16, b_eff, gamma2, *, tm=512, tn=None):
    """x: (M, D); w_bf16: (D, D) = W^T in bf16; b_eff, gamma2: (1, D) f32."""
    M, D = x.shape
    assert w_bf16.shape == (D, D)

    # Generation-aware VMEM budget (~75% of physical capacity).
    try:
        vmem_cap = pltpu.get_tpu_info().vmem_capacity_bytes
    except Exception:  # pragma: no cover - fallback if query unavailable
        vmem_cap = 64 * 1024 * 1024
    vmem_limit = int(vmem_cap * 0.75)

    # Weight strategy: resident (tn == D) unless a resident bf16 weight would
    # dominate the VMEM budget, in which case stream it over an N grid axis.
    if tn is None:
        if 2 * D * D > vmem_limit // 2 and D % 128 == 0:
            tn = 512 if D % 512 == 0 else (256 if D % 256 == 0 else 128)
        else:
            tn = D
    assert D % tn == 0, "tn must divide D"
    n_n = D // tn

    # Row tile: keep it big (HBM roofline) but keep >= 2 grid steps along M
    # when possible; pad ragged M instead of collapsing to tiny tiles.
    def _round_up(a, b):
        return ((a + b - 1) // b) * b

    if M >= 2 * tm:
        tm_eff = tm
    else:
        tm_eff = max(8, _round_up((M + 1) // 2, 8))
    m_pad = _round_up(M, tm_eff)
    x_p = x if m_pad == M else jnp.pad(x, ((0, m_pad - M), (0, 0)))
    n_m = m_pad // tm_eff

    # Buffering: single-buffer the resident weight (constant index map);
    # deeper buffering when it is streamed per N tile.
    if n_n == 1:
        w_mode = pl.Buffered(1)
    elif n_n >= 4:
        w_mode = pl.Buffered(3)
    else:
        w_mode = None  # default double buffering

    out = pl.pallas_call(
        functools.partial(_im2text_kernel, tn=tn, eps=LN_EPS),
        out_shape=jax.ShapeDtypeStruct((m_pad, D), x.dtype),
        grid_spec=pltpu.PrefetchScalarGridSpec(
            num_scalar_prefetch=0,
            grid=(n_m, n_n),
            in_specs=[
                # x rows: streams over M, stays resident across the N axis.
                pl.BlockSpec((tm_eff, D), lambda i, j: (i, 0)),
                # weight: resident (n_n == 1) or streamed per output tile.
                pl.BlockSpec((D, tn), lambda i, j: (0, j), pipeline_mode=w_mode),
                # fused bias (b + beta @ W^T).
                pl.BlockSpec((1, tn), lambda i, j: (0, j)),
                # LN gamma: constant -> single buffer.
                pl.BlockSpec((1, D), lambda i, j: (0, 0),
                             pipeline_mode=pl.Buffered(1)),
            ],
            out_specs=pl.BlockSpec((tm_eff, tn), lambda i, j: (i, j)),
            scratch_shapes=[pltpu.VMEM((tm_eff, D), jnp.bfloat16)],
        ),
        compiler_params=pltpu.CompilerParams(
            dimension_semantics=("parallel", "arbitrary"),
            vmem_limit_bytes=vmem_limit,
        ),
    )(x_p, w_bf16, b_eff, gamma2)

    return out if m_pad == M else out[:M]


# --------------------------------------------------------------------------
# Pure-JAX reference (torch semantics, full f32)
# --------------------------------------------------------------------------
def im2text_reference(x, w, b, gamma, beta, *, eps=LN_EPS):
    """w in torch layout (D_out, D_in)."""
    xf = x.astype(jnp.float32)
    mean = jnp.mean(xf, axis=-1, keepdims=True)
    var = jnp.mean((xf - mean) ** 2, axis=-1, keepdims=True)
    ln = (xf - mean) * jax.lax.rsqrt(var + eps) * gamma + beta
    return (xf + ln @ w.T + b).astype(x.dtype)


if __name__ == "__main__":
    # Small shapes consistent with the module (embed_dim = output_dim = D);
    # M = batch * num_visual_tokens flattened.
    M, D = 512, 256
    key = jax.random.PRNGKey(0)
    kx, kw, kb, kg, kbe = jax.random.split(key, 5)

    x = jax.random.normal(kx, (M, D), dtype=jnp.float32)
    # Synthetic nn.Linear(D, D) + nn.LayerNorm(D) parameters (torch layouts).
    w = jax.random.normal(kw, (D, D), dtype=jnp.float32) * (1.0 / jnp.sqrt(D))
    b = 0.01 * jax.random.normal(kb, (D,), dtype=jnp.float32)
    gamma = 1.0 + 0.1 * jax.random.normal(kg, (D,), dtype=jnp.float32)
    beta = 0.05 * jax.random.normal(kbe, (D,), dtype=jnp.float32)

    # One-time parameter prep (hoisted out of the per-call path).
    w_bf16, b_eff, gamma2 = im2text_prepare_params(w, b, gamma, beta)

    ref = im2text_reference(x, w, b, gamma, beta)

    # Resident-weight fast path (tn == D), grid (2, 1).
    fwd = jax.jit(im2text_forward)
    out = jax.block_until_ready(fwd(x, w_bf16, b_eff, gamma2))
    assert jnp.allclose(out, ref, atol=5e-2, rtol=5e-2), "mismatch vs f32 reference"

    # Force the streamed / N-tiled weight path (the large-D / v7x path) and
    # check it matches the resident path.
    fwd_nt = jax.jit(functools.partial(im2text_forward, tn=128))
    out_nt = jax.block_until_ready(fwd_nt(x, w_bf16, b_eff, gamma2))
    assert jnp.allclose(out_nt, out, atol=1e-4, rtol=1e-4), "N-tiled path mismatch"

    # Ragged row count -> padded internally and sliced back.
    x_r = x[:72]
    out_r = jax.block_until_ready(fwd(x_r, w_bf16, b_eff, gamma2))
    assert jnp.allclose(out_r, ref[:72], atol=5e-2, rtol=5e-2), "ragged-M mismatch"

    print("KERNEL_OK")
</pallas_src>

<mosaic_0001>
module attributes {stable_mosaic.version = 11 : i64} {
  func.func @_im2text_kernel(%arg0: i32, %arg1: i32, %arg2: memref<256x256xf32, #tpu.memory_space<vmem>>, %arg3: memref<256x256xbf16, #tpu.memory_space<vmem>>, %arg4: memref<1x256xf32, #tpu.memory_space<vmem>>, %arg5: memref<1x256xf32, #tpu.memory_space<vmem>>, %arg6: memref<256x256xf32, #tpu.memory_space<vmem>>, %arg7: memref<256x256xbf16, #tpu.memory_space<vmem>>) attributes {dimension_semantics = [#tpu.dimension_semantics<parallel>, #tpu.dimension_semantics<arbitrary>], iteration_bounds = array<i64: 2, 1>, scalar_prefetch = 0 : i64, scratch_operands = 1 : i64, tpu.core_type = #tpu.core_type<tc>, window_params = [{transform_indices = @transform_0, window_bounds = array<i64: 256, 256>}, {pipeline_mode = #tpu.pipeline_mode<synchronous>, transform_indices = @transform_1, window_bounds = array<i64: 256, 256>}, {transform_indices = @transform_2, window_bounds = array<i64: 1, 256>}, {pipeline_mode = #tpu.pipeline_mode<synchronous>, transform_indices = @transform_3, window_bounds = array<i64: 1, 256>}, {transform_indices = @transform_4, window_bounds = array<i64: 256, 256>}]} {
    %c0_i32 = arith.constant 0 : i32
    %0 = arith.cmpi eq, %arg1, %c0_i32 : i32
    %1 = arith.extui %0 : i1 to i32
    %c0_i32_0 = arith.constant 0 : i32
    %2 = arith.cmpi ne, %1, %c0_i32_0 : i32
    scf.if %2 {
      %c0_9 = arith.constant 0 : index
      %c0_10 = arith.constant 0 : index
      %15 = vector.load %arg2[%c0_9, %c0_10] : memref<256x256xf32, #tpu.memory_space<vmem>>, vector<256x256xf32>
      %cst_11 = arith.constant dense<0.000000e+00> : vector<256xf32>
      %16 = vector.multi_reduction <add>, %15, %cst_11 [1] : vector<256x256xf32> to vector<256xf32>
      %17 = vector.shape_cast %16 : vector<256xf32> to vector<256x1xf32>
      %18 = arith.mulf %15, %15 : vector<256x256xf32>
      %cst_12 = arith.constant dense<0.000000e+00> : vector<256xf32>
      %19 = vector.multi_reduction <add>, %18, %cst_12 [1] : vector<256x256xf32> to vector<256xf32>
      %20 = vector.shape_cast %19 : vector<256xf32> to vector<256x1xf32>
      %cst_13 = arith.constant 3.906250e-03 : f32
      %21 = vector.broadcast %cst_13 : f32 to vector<256x1xf32>
      %22 = arith.mulf %17, %21 : vector<256x1xf32>
      %cst_14 = arith.constant 3.906250e-03 : f32
      %23 = vector.broadcast %cst_14 : f32 to vector<256x1xf32>
      %24 = arith.mulf %20, %23 : vector<256x1xf32>
      %25 = arith.mulf %22, %22 : vector<256x1xf32>
      %26 = arith.subf %24, %25 : vector<256x1xf32>
      %cst_15 = arith.constant 0.000000e+00 : f32
      %27 = vector.broadcast %cst_15 : f32 to vector<256x1xf32>
      %28 = arith.maximumf %26, %27 : vector<256x1xf32>
      %cst_16 = arith.constant 9.99999974E-6 : f32
      %29 = vector.broadcast %cst_16 : f32 to vector<256x1xf32>
      %30 = arith.addf %28, %29 : vector<256x1xf32>
      %31 = math.rsqrt %30 : vector<256x1xf32>
      %c0_17 = arith.constant 0 : index
      %c0_18 = arith.constant 0 : index
      %32 = vector.load %arg5[%c0_17, %c0_18] : memref<1x256xf32, #tpu.memory_space<vmem>>, vector<1x256xf32>
      %33 = vector.broadcast %31 : vector<256x1xf32> to vector<256x256xf32>
      %34 = vector.broadcast %32 : vector<1x256xf32> to vector<256x256xf32>
      %35 = arith.mulf %33, %34 : vector<256x256xf32>
      %36 = vector.broadcast %22 : vector<256x1xf32> to vector<256x256xf32>
      %37 = arith.subf %15, %36 : vector<256x256xf32>
      %38 = arith.mulf %37, %35 : vector<256x256xf32>
      %39 = arith.truncf %38 : vector<256x256xf32> to vector<256x256xbf16>
      %c0_19 = arith.constant 0 : index
      %c0_20 = arith.constant 0 : index
      %40 = vector.load %arg7[%c0_19, %c0_20] : memref<256x256xbf16, #tpu.memory_space<vmem>>, vector<256x256xbf16>
      tpu.vector_store %arg7[%c0_19, %c0_20], %39 {strides = array<i32>} : memref<256x256xbf16, #tpu.memory_space<vmem>>, vector<256x256xbf16>,
    } else {
    }
    %c0 = arith.constant 0 : index
    %c0_1 = arith.constant 0 : index
    %3 = vector.load %arg7[%c0, %c0_1] : memref<256x256xbf16, #tpu.memory_space<vmem>>, vector<256x256xbf16>
    %c0_2 = arith.constant 0 : index
    %c0_3 = arith.constant 0 : index
    %4 = vector.load %arg3[%c0_2, %c0_3] : memref<256x256xbf16, #tpu.memory_space<vmem>>, vector<256x256xbf16>
    %cst = arith.constant dense<0.000000e+00> : vector<256x256xf32>
    %5 = tpu.matmul %3, %4, %cst {dimension_numbers = #tpu.dot_dimension_numbers<[1], [0], [0], [1], [0, 0, 1, 1], [], []>} : vector<256x256xbf16>, vector<256x256xbf16>, vector<256x256xf32> -> vector<256x256xf32>
    %c256_i32 = arith.constant 256 : i32
    %6 = arith.muli %arg1, %c256_i32 : i32
    %7 = tpu.assume_multiple %6, 256 : i32
    %c0_4 = arith.constant 0 : index
    %8 = arith.index_cast %7 : i32 to index
    %9 = vector.load %arg2[%c0_4, %8] : memref<256x256xf32, #tpu.memory_space<vmem>>, vector<256x256xf32>
    %10 = arith.addf %9, %5 : vector<256x256xf32>
    %c0_5 = arith.constant 0 : index
    %c0_6 = arith.constant 0 : index
    %11 = vector.load %arg4[%c0_5, %c0_6] : memref<1x256xf32, #tpu.memory_space<vmem>>, vector<1x256xf32>
    %12 = vector.broadcast %11 : vector<1x256xf32> to vector<256x256xf32>
    %13 = arith.addf %10, %12 : vector<256x256xf32>
    %c0_7 = arith.constant 0 : index
    %c0_8 = arith.constant 0 : index
    %14 = vector.load %arg6[%c0_7, %c0_8] : memref<256x256xf32, #tpu.memory_space<vmem>>, vector<256x256xf32>
    tpu.vector_store %arg6[%c0_7, %c0_8], %13 {strides = array<i32>} : memref<256x256xf32, #tpu.memory_space<vmem>>, vector<256x256xf32>,
    return
  }
  func.func @transform_0(%arg0: i32, %arg1: i32) -> (i32, i32) {
    %c0_i32 = arith.constant 0 : i32
    %c0_i32_0 = arith.constant 0 : i32
    return %arg0, %c0_i32 : i32, i32
  }
  func.func @transform_1(%arg0: i32, %arg1: i32) -> (i32, i32) {
    %c0_i32 = arith.constant 0 : i32
    %c0_i32_0 = arith.constant 0 : i32
    return %c0_i32, %arg1 : i32, i32
  }
  func.func @transform_2(%arg0: i32, %arg1: i32) -> (i32, i32) {
    %c0_i32 = arith.constant 0 : i32
    %c0_i32_0 = arith.constant 0 : i32
    return %c0_i32, %arg1 : i32, i32
  }
  func.func @transform_3(%arg0: i32, %arg1: i32) -> (i32, i32) {
    %c0_i32 = arith.constant 0 : i32
    %c0_i32_0 = arith.constant 0 : i32
    %c0_i32_1 = arith.constant 0 : i32
    return %c0_i32, %c0_i32_0 : i32, i32
  }
  func.func @transform_4(%arg0: i32, %arg1: i32) -> (i32, i32) {
    %c0_i32 = arith.constant 0 : i32
    return %arg0, %arg1 : i32, i32
  }
}

</mosaic_0001>

<bundles_post_ra>
// kernel: im2text_forward.1
= control target key start
LH: loop header
LB: loop body
LE: loop exit
PB: predicated region body
PF: predicated region fallthrough
CT: control target
= control target key end

     0   :  { %9 = vsyncpa [#allocation4], 0  ;;  %s3355_s0 = inlined_call_operand.hbm [shape: f32[512,256], index: 0, kind: input, shape index: {}]   ;;  %s3356_s1 = inlined_call_operand.hbm [shape: bf16[256,256], index: 1, kind: input, shape index: {}]   ;;  %s3357_s2 = inlined_call_operand.vmem [shape: f32[1,256], index: 2, kind: input, shape index: {}]   ;;  %s3358_s3 = inlined_call_operand.vmem [shape: f32[1,256], index: 3, kind: input, shape index: {}]   ;;  %s3359_s4 = inlined_call_operand.hbm [shape: f32[512,256], index: 4, kind: output, shape index: {}]  }
   0x1   :  { %11 = vsyncpa [#allocation4 + $0x1], 0 }
   0x2   :  { %12 = vsyncpa [#allocation7], 0 }
   0x3   :  { %13 = vsyncpa [#allocation5], 0 }
   0x4   :  { %15 = vsyncpa [#allocation5 + $0x1], 0  ;;  %s2410_s15 = smov 0   ;;  %s2412_s16 = smov 0  }
   0x5   :  { %s2414_s17 = smov 0   ;;  %s2416_s18 = smov 0  }
   0x6   :  { %s2418_s19 = smov 0   ;;  %s2420_s20 = smov 0  }
   0x7 LB: > { %s1910_s21 = sadd.s32 4294967295, %s2374_s20   ;;  %s1911_s22 = sadd.s32 4294967294, %s2374_s20   ;;  %s2374_s20 = sphi %s2420_s20, %s21_s20   ;;  %s2370_s19 = sphi %s2418_s19, %s3383_s19   ;;  %s2366_s18 = sphi %s2416_s18, %s3382_s18   ;;  %s2362_s17 = sphi %s2414_s17, %s3381_s17   ;;  %s2358_s16 = sphi %s2412_s16, %s3380_s16   ;;  %s2354_s15 = sphi %s2410_s15, %s3379_s15  }
   0x8   : > { %p53_p0 = scmp.ne.s32.totalorder %s2358_s16, %s2354_s15  ;;  %p2444_p1 = scmp.eq.s32.totalorder %s1910_s21, 0 }
   0x9   : > { %p2448_p2 = scmp.eq.s32.totalorder %s1910_s21, 1  ;;  %p158_p3 = scmp.eq.s32.totalorder %s1911_s22, 1 }
   0xa   : > { %s3364_s23 = scalar_select %p2444_p1, 1, 0 }
   0xb   : > { %s3365_s24 = scalar_select %p2448_p2, 1, 0 }
   0xc   : > { %p2454_p4 = por %p2444_p1, %p53_p0  ;;  %p1912_p5 = scmp.ge.s32.totalorder %s2374_s20, 1 }
   0xd   : > { %p2459_p6 = por %p158_p3, %p53_p0  ;;  %p165_p7 = scmp.lt.s32.totalorder %s2374_s20, 3 }
   0xe   : > { %s3366_s25 = scalar_select %p2454_p4, 1, 0 }
   0xf   : > { %s3367_s26 = scalar_select %p2459_p6, 1, 0 }
  0x10   : > { %p2464_p8 = pnand %p1912_p5, %p165_p7  ;;  %s2376_s28 = smov [#allocation6]  }
  0x11   : > { %s180_s29 = sshll.u32 %s2376_s28, 4  ;;  %s33_s5 = sadd.s32 1, %s2370_s19  ;;  %s181_s29 = int_to_ptr.vmem [resolvable:$true] %s180_s29 }
  0x12   : > { %s3368_s27 = scalar_select %p2464_p8, 1, 0 }
  0x13   : > { %p2006_p9 = pneg %p2464_p8  ;;  %s2230_s8 = scalar_lea.hbm %s3356_s1, 4096 }
  0x14   : > { %p2231_p12 = scmp.ne.s32.totalorder %s3356_s1, %s2230_s8  ;;  %p2237_p5 = scmp.lt.u32.totalorder %s2230_s8, %s3356_s1 }
  0x15   : > { %p2473_p11 = pnand %p2006_p9, %p2444_p1 }
  0x17   : > { %p2232_p13 = pneg %p2473_p11 }
  0x19   : > { %p2233_p0 = pnand %p2232_p13, %p2231_p12 }
  0x1b   : > { %p2234_p3 = pneg %p2233_p0 }
  0x1d   : > { %p2239_p7 = pnand %p2237_p5, %p2234_p3 }
  0x1f   : > { %2242 = shalt.err (!%p2239_p7)
}
  0x20   : > { %s2243_s13 = scalar_lea.vmem %s181_s29, 4096  ;;  %p2251_p1 = scmp.lt.s32.totalorder %s181_s29, %s181_s29 }
  0x21   : > { %p2244_p9 = scmp.ne.s32.totalorder %s181_s29, %s2243_s13  ;;  %p2252_p4 = scmp.lt.s32.totalorder %s2243_s13, %s2243_s13 }
  0x23   : > { %p2246_p10 = pnand %p2244_p9, %p2232_p13  ;;  %p2253_p8 = por %p2252_p4, %p2251_p1 }
  0x25   : > { %p2247_p6 = pneg %p2246_p10 }
  0x27   : > { %p2254_p2 = pnand %p2253_p8, %p2247_p6 }
  0x29   : > { %2257 = shalt.err (!%p2254_p2)
}
  0x2a   : > { %s2377_s14 = smov 128   ;;  %s2378_s21 = smov 8  }
  0x2b   : > { %2009 = dma.hbm_to_vmem [thread:$0]  (!%p2473_p11), %s3356_s1, 4096, %s181_s29, [#allocation7], %s2377_s14, %s2377_s14, %s2378_s21  }
  0x2c   : > { %p35_p1 = scmp.ge.s32.totalorder %s33_s5, 2  ;;  %s40_s6 = sadd.s32 1, %s2362_s17 }
  0x2d   : > { %p47_p2 = scmp.ne.s32.totalorder %s2362_s17, %s2358_s16  ;;  %p48_p4 = scmp.eq.s32.totalorder %s2374_s20, 0 }
  0x2e   : > { %s3385_s5 = smov (%p35_p1, %s33_s5), 0  ;;  %p3371_p8 = scmp.ne.s32.totalorder %s3365_s24, 0 }
  0x2f   : > { %p2500_p6 = por %p48_p4, %p47_p2  ;;  %s37_s30 = ssub.s32 %s2370_s19, %s3385_s5 }
  0x30   : > { %p2506_p10 = por %p3371_p8, %p47_p2  ;;  %p2019_p12 = scmp.lt.s32.totalorder %s2374_s20, 2 }
  0x31   : > { %p38_p11 = scmp.eq.s32.totalorder %s37_s30, 0  ;;  %s205_s29 = sand.u32 1, %s2362_s17  }
  0x32   : > { %s1916_s9 = sshll.u32 %s205_s29, 9  ;;  %s1963_s11 = sshll.u32 %s2370_s19, 13 }
  0x33   : > { %s2515_s10 = scalar_select %p38_p11, %s2362_s17, %s40_s6  }
  0x34   : > { %s2521_s14 = scalar_lea.hbm %s3355_s0, %s1963_s11  ;;  %s209_s24 = scalar_lea.vmem [#allocation3], %s1916_s9 }
  0x35   : > { %s217_s21 = sshll.u32 %s209_s24, 4  ;;  %p2527_p13 = pnand %p2019_p12, %p2500_p6  ;;  %s2523_s21 = int_to_ptr.vmem [resolvable:$true] %s217_s21 }
  0x36   : > { %s2531_s28 = scalar_lea.sflag [#allocation4], %s205_s29  ;;  %s2258_s6 = scalar_lea.hbm %s2521_s14, 8192 }
  0x37   : > { %p2259_p0 = scmp.ne.s32.totalorder %s2521_s14, %s2258_s6  ;;  %p2260_p3 = pneg %p2527_p13 }
  0x38   : > { %s2263_s7 = scalar_lea.hbm %s3355_s0, 16384  ;;  %p2264_p9 = scmp.lt.u32.totalorder %s2521_s14, %s3355_s0 }
  0x39   : > { %p2261_p5 = pnand %p2260_p3, %p2259_p0  ;;  %p2265_p1 = scmp.lt.u32.totalorder %s2263_s7, %s2258_s6 }
  0x3a   : > { %p2267_p4 = scmp.lt.u32.totalorder %s2258_s6, %s2521_s14 }
  0x3b   : > { %p2262_p7 = pneg %p2261_p5  ;;  %p2266_p2 = por %p2265_p1, %p2264_p9 }
  0x3d   : > { %p2268_p6 = por %p2267_p4, %p2266_p2 }
  0x3f   : > { %p2269_p8 = pnand %p2268_p6, %p2262_p7 }
  0x41   : > { %2272 = shalt.err (!%p2269_p8)
}
  0x42   : > { %s2273_s29 = scalar_lea.vmem %s2523_s21, 8192  ;;  %s2379_s13 = smov [#allocation3]  }
  0x43   : > { %p2274_p12 = scmp.ne.s32.totalorder %s2523_s21, %s2273_s29  ;;  %s2278_s24 = sshll.u32 %s2379_s13, 4  ;;  %s2279_s24 = int_to_ptr.vmem [resolvable:$false] %s2278_s24 }
  0x44   : > { %s2280_s30 = scalar_lea.vmem %s2279_s24, 16384  ;;  %p2281_p5 = scmp.lt.s32.totalorder %s2523_s21, %s2279_s24 }
  0x45   : > { %p2276_p11 = pnand %p2274_p12, %p2260_p3  ;;  %p2282_p9 = scmp.lt.s32.totalorder %s2280_s30, %s2273_s29 }
  0x47   : > { %p2277_p0 = pneg %p2276_p11  ;;  %p2283_p1 = por %p2282_p9, %p2281_p5 }
  0x49   : > { %p2284_p2 = pnand %p2283_p1, %p2277_p0 }
  0x4b   : > { %2287 = shalt.err (!%p2284_p2)
}
  0x4c   : > { %s2380_s6 = smov 256   ;;  %s2381_s9 = smov 16  }
  0x4d   : > { %2013 = dma.hbm_to_vmem [thread:$0]  (!%p2527_p13), %s2521_s14, 8192, %s2523_s21, %s2531_s28, %s2380_s6, %s2380_s6, %s2381_s9  }
  0x4e   : > { %p3374_p3 = scmp.ne.s32.totalorder %s3368_s27, 0 }
  0x4f   : > { %s2562_s7 = sand.u32 (!%p3374_p3), 1, %s2358_s16   ;;  %p3375_p7 = scmp.ne.s32.totalorder (!%p3374_p3), %s3366_s25, 0 }
  0x50   : > { %229 = sbr.rel (%p3374_p3) target bundleno = 621 (0x26d), region = 36  ;;  %s1921_s11 = sshll.u32 (!%p3374_p3), %s2562_s7, 9 }
  0x51   : > { %s232_s12 = scalar_lea.sflag (!%p3374_p3), [#allocation4], %s2562_s7  ;;  %s2568_s29 = scalar_lea.vmem (!%p3374_p3), [#allocation3], %s1921_s11 }
  0x57   : > { %2341 = dma.done.wait (%p3375_p7), %s232_s12, 8192  }
  0x58   : > { %2343 = vsyncadd (%p3375_p7), %s232_s12, 4294959104  ;;  %p3376_p13 = scmp.ne.s32.totalorder %s3364_s23, 0 }
  0x5a   : > { %2345 = dma.done.wait (%p3376_p13), [#allocation7], 4096  }
  0x5b   : > { %2347 = vsyncadd (%p3376_p13), [#allocation7], 4294963200  ;;  %v2579_v0 = vld [vmem:[%s2568_s29 + $0x100] sm:$0xff]  ;;  %v2582_v1 = vld [vmem:[%s2568_s29 + $0x108] sm:$0xff]  ;;  %s3111_s21 = scalar_lea.vmem [#allocation8], %s1921_s11  ;;  %s1965_s22 = sshll.u32 %s2366_s18, 13 }
  0x5c   : > { %v2585_v2 = vld [vmem:[%s2568_s29] sm:$0xff]  ;;  %v393_v3 = vadd.f32 %v2582_v1, %v2579_v0  ;;  %v2590_v4 = vld [vmem:[%s2568_s29 + $0x8] sm:$0xff]  ;;  %v2593_v5 = vld [vmem:[%s2568_s29 + $0x110] sm:$0xff]  ;;  %v473_v20 = vmul.f32 %v2579_v0, %v2579_v0  ;;  %v474_v21 = vmul.f32 %v2582_v1, %v2582_v1  ;;  %s1800_s28 = sshll.u32 %s3111_s21, 4  ;;  %s3300_s18 = scalar_lea.hbm %s3359_s4, %s1965_s22  ;;  %s3302_s28 = int_to_ptr.vmem [resolvable:$true] %s1800_s28 }
  0x5d   : > { %v2596_v6 = vld [vmem:[%s2568_s29 + $0x118] sm:$0xff]  ;;  %v345_v7 = vadd.f32 %v2590_v4, %v2585_v2  ;;  %v2601_v8 = vld [vmem:[%s2568_s29 + $0x10] sm:$0xff]  ;;  %v441_v14 = vmul.f32 %v2585_v2, %v2585_v2  ;;  %v442_v15 = vmul.f32 %v2590_v4, %v2590_v4  ;;  %v475_v17 = vmul.f32 %v2593_v5, %v2593_v5  ;;  %v2633_v26 = vld [vmem:[%s2568_s29 + $0x20] sm:$0xff]  ;;  %s1784_s30 = scalar_lea.sflag [#allocation5], %s2562_s7  ;;  %s2288_s6 = scalar_lea.vmem %s3302_s28, 8192 }
  0x5e   : > { %v2604_v9 = vld [vmem:[%s2568_s29 + $0x18] sm:$0xff]  ;;  %394 = vadd.xlane.f32.xlu1 %v393_v3  ;;  %v396_v10 = vadd.f32 %v2596_v6, %v2593_v5  ;;  %v443_v11 = vmul.f32 %v2601_v8, %v2601_v8  ;;  %v476_v18 = vmul.f32 %v2596_v6, %v2596_v6  ;;  %v553_v23 = vadd.f32 %v474_v21, %v473_v20  ;;  %v2627_v24 = vld [vmem:[%s2568_s29 + $0x30] sm:$0xff]  ;;  %v2636_v27 = vld [vmem:[%s2568_s29 + $0x28] sm:$0xff]  ;;  %p2289_p4 = scmp.ne.s32.totalorder %s3302_s28, %s2288_s6  ;;  %s2382_s9 = smov [#allocation8]  }
  0x5f   : > { %v444_v12 = vmul.f32 %v2604_v9, %v2604_v9  ;;  %346 = vadd.xlane.f32.xlu0 %v345_v7  ;;  %v348_v13 = vadd.f32 %v2604_v9, %v2601_v8  ;;  %v505_v19 = vadd.f32 %v442_v15, %v441_v14  ;;  %v2630_v25 = vld [vmem:[%s2568_s29 + $0x38] sm:$0xff]  ;;  %v351_v29 = vadd.f32 %v2636_v27, %v2633_v26  ;;  %v319_v30 = vld [vmem:[%s2568_s29 + $0x130] sm:$0xff]  ;;  %v317_v32 = vld [vmem:[%s2568_s29 + $0x120] sm:$0xff]  ;;  %s2292_s11 = sshll.u32 %s2382_s9, 4  ;;  %s2293_s11 = int_to_ptr.vmem [resolvable:$false] %s2292_s11 }
  0x60   : > { %v556_v22 = vadd.f32 %v476_v18, %v475_v17  ;;  %v354_v28 = vadd.f32 %v2630_v25, %v2627_v24  ;;  %v2644_v31 = vld [vmem:[%s2568_s29 + $0x138] sm:$0xff]  ;;  %v318_v33 = vld [vmem:[%s2568_s29 + $0x128] sm:$0xff]  ;;  %v447_v35 = vmul.f32 %v2627_v24, %v2627_v24  ;;  %v448_v36 = vmul.f32 %v2630_v25, %v2630_v25  ;;  %v2660_v49 = vld [vmem:[%s2568_s29 + $0x50] sm:$0xff]  ;;  %p2290_p6 = pnand %p2289_p4, %p2506_p10  ;;  %s2294_s12 = scalar_lea.vmem %s2293_s11, 16384 }
  0x61   : > { %v508_v16 = vadd.f32 %v444_v12, %v443_v11  ;;  %v402_v34 = vadd.f32 %v2644_v31, %v319_v30  ;;  %v2077_v37 = vld [vmem:[#allocation6 + $0x4] ss:$8 sps:$4 sm:$0xff]   ;;  %v399_v38 = vadd.f32 %v318_v33, %v317_v32  ;;  %v445_v39 = vmul.f32 %v2633_v26, %v2633_v26  ;;  %v2079_v41 = vld [vmem:[#allocation6] ss:$8 sps:$4 sm:$0xff]   ;;  %v2080_v42 = vld [vmem:[#allocation6 + $0x14] ss:$8 sps:$4 sm:$0xff]   ;;  %p2295_p12 = scmp.lt.s32.totalorder %s3302_s28, %s2293_s11  ;;  %p2296_p11 = scmp.lt.s32.totalorder %s2294_s12, %s2288_s6 }
  0x62   : > { %397 = vadd.xlane.f32.xlu1 %v396_v10  ;;  %v446_v40 = vmul.f32 %v2636_v27, %v2636_v27  ;;  %1317 = vmatprep.subr.bf16.mxu0 %v2077_v37  ;;  %v514_v43 = vadd.f32 %v448_v36, %v447_v35  ;;  %v479_v44 = vmul.f32 %v319_v30, %v319_v30  ;;  %v2082_v50 = vld [vmem:[#allocation6 + $0x10] ss:$8 sps:$4 sm:$0xff]   ;;  %v2083_v53 = vld [vmem:[#allocation6 + $0x24] ss:$8 sps:$4 sm:$0xff]   ;;  %v2085_v58 = vld [vmem:[#allocation6 + $0x20] ss:$8 sps:$4 sm:$0xff]   ;;  %p2291_p8 = pneg %p2290_p6 }
  0x63   : > { %349 = vadd.xlane.f32.xlu0 %v348_v13  ;;  %1966 = vmatprep.subr.bf16.mxu1 %v2077_v37  ;;  %v480_v45 = vmul.f32 %v2644_v31, %v2644_v31  ;;  %v477_v47 = vmul.f32 %v317_v32, %v317_v32  ;;  %v478_v48 = vmul.f32 %v318_v33, %v318_v33  ;;  %v2663_v52 = vld [vmem:[%s2568_s29 + $0x58] sm:$0xff]  ;;  %v2666_v55 = vld [vmem:[%s2568_s29 + $0x40] sm:$0xff]  ;;  %v2669_v56 = vld [vmem:[%s2568_s29 + $0x48] sm:$0xff]  ;;  %p2297_p0 = por %p2296_p11, %p2295_p12 }
  0x64   : > { %v511_v46 = vadd.f32 %v446_v40, %v445_v39  ;;  %1318 = vmatpush1.bf16.msra.mxu0 %v2079_v41  ;;  %1982 = vmatpush1.bf16.msra.mxu1 %v2079_v41  ;;  %v323_v57 = vld [vmem:[%s2568_s29 + $0x150] sm:$0xff]  ;;  %v360_v59 = vadd.f32 %v2663_v52, %v2660_v49  ;;  %v324_v60 = vld [vmem:[%s2568_s29 + $0x158] sm:$0xff]  ;;  %v357_v62 = vadd.f32 %v2669_v56, %v2666_v55  ;;  %v321_v63 = vld [vmem:[%s2568_s29 + $0x140] sm:$0xff] }
  0x65   : > { %1319 = vmatprep.subr.bf16.mxu0 %v2080_v42  ;;  %v562_v51 = vadd.f32 %v480_v45, %v479_v44  ;;  %v559_v54 = vadd.f32 %v478_v48, %v477_v47  ;;  %1967 = vmatprep.subr.bf16.mxu1 %v2080_v42  ;;  %v2086_v61 = vld [vmem:[#allocation6 + $0x34] ss:$8 sps:$4 sm:$0xff]   ;;  %v322_v3 = vld [vmem:[%s2568_s29 + $0x148] sm:$0xff]  ;;  %v2088_v7 = vld [vmem:[#allocation6 + $0x30] ss:$8 sps:$4 sm:$0xff]   ;;  %v408_v10 = vadd.f32 %v324_v60, %v323_v57  ;;  %p2298_p5 = pnand %p2297_p0, %p2291_p8 }
  0x66   : > { %509 = vadd.xlane.f32.xlu1 %v508_v16  ;;  %v451_v11 = vmul.f32 %v2660_v49, %v2660_v49  ;;  %v452_v12 = vmul.f32 %v2663_v52, %v2663_v52  ;;  %v2089_v13 = vld [vmem:[#allocation6 + $0x44] ss:$8 sps:$4 sm:$0xff]   ;;  %v405_v14 = vadd.f32 %v322_v3, %v321_v63  ;;  %v449_v15 = vmul.f32 %v2666_v55, %v2666_v55  ;;  %v2091_v17 = vld [vmem:[#allocation6 + $0x40] ss:$8 sps:$4 sm:$0xff]   ;;  %v2092_v21 = vld [vmem:[#allocation6 + $0x54] ss:$8 sps:$4 sm:$0xff]  }
  0x67   : > { %506 = vadd.xlane.f32.xlu0 %v505_v19  ;;  %v450_v16 = vmul.f32 %v2669_v56, %v2669_v56  ;;  %v483_v19 = vmul.f32 %v323_v57, %v323_v57  ;;  %v484_v20 = vmul.f32 %v324_v60, %v324_v60  ;;  %v2095_v32 = vld [vmem:[#allocation6 + $0x64] ss:$8 sps:$4 sm:$0xff]   ;;  %v2691_v35 = vld [vmem:[%s2568_s29 + $0x78] sm:$0xff]  ;;  %v327_v42 = vld [vmem:[%s2568_s29 + $0x170] sm:$0xff] }
  0x68   : > { %1320 = vmatpush1.bf16.msra.mxu0 %v2082_v50  ;;  %1983 = vmatpush1.bf16.msra.mxu1 %v2082_v50  ;;  %v520_v18 = vadd.f32 %v452_v12, %v451_v11  ;;  %v2694_v36 = vld [vmem:[%s2568_s29 + $0x60] sm:$0xff]  ;;  %v2697_v37 = vld [vmem:[%s2568_s29 + $0x68] sm:$0xff]  ;;  %v2098_v40 = vld [vmem:[#allocation6 + $0x74] ss:$8 sps:$4 sm:$0xff]   ;;  %v456_v50 = vmul.f32 %v2691_v35, %v2691_v35  ;;  %v487_v60 = vmul.f32 %v327_v42, %v327_v42 }
  0x69   : > { %1321 = vmatprep.subr.bf16.mxu0 %v2083_v53  ;;  %1968 = vmatprep.subr.bf16.mxu1 %v2083_v53  ;;  %v568_v30 = vadd.f32 %v484_v20, %v483_v19  ;;  %v363_v41 = vadd.f32 %v2697_v37, %v2694_v36  ;;  %v325_v44 = vld [vmem:[%s2568_s29 + $0x160] sm:$0xff]  ;;  %v326_v45 = vld [vmem:[%s2568_s29 + $0x168] sm:$0xff]  ;;  %v454_v57 = vmul.f32 %v2697_v37, %v2697_v37  ;;  %v2110_v20 = vld [vmem:[#allocation6 + $0xb4] ss:$8 sps:$4 sm:$0xff]  }
  0x6a   : > { %557 = vadd.xlane.f32.xlu1 %v556_v22  ;;  %v517_v22 = vadd.f32 %v450_v16, %v449_v15  ;;  %v411_v53 = vadd.f32 %v326_v45, %v325_v44  ;;  %v2107_v12 = vld [vmem:[#allocation6 + $0xa4] ss:$8 sps:$4 sm:$0xff]   ;;  %v2719_v15 = vld [vmem:[%s2568_s29 + $0x98] sm:$0xff] }
  0x6b   : > { %554 = vadd.xlane.f32.xlu0 %v553_v23  ;;  %v481_v23 = vmul.f32 %v321_v63, %v321_v63  ;;  %v297_v16 = vld [vmem:[%s2568_s29 + $0x80] sm:$0xff] }
  0x6c   : > { %1322 = vmatpush1.bf16.msra.mxu0 %v2085_v58  ;;  %1984 = vmatpush1.bf16.msra.mxu1 %v2085_v58  ;;  %v2103_v58 = vld [vmem:[#allocation6 + $0x80] ss:$8 sps:$4 sm:$0xff]  }
  0x6d   : > { %1323 = vmatprep.subr.bf16.mxu0 %v2086_v61  ;;  %1969 = vmatprep.subr.bf16.mxu1 %v2086_v61 }
  0x6e   : > { %355 = vadd.xlane.f32.xlu1 %v354_v28  ;;  %v482_v28 = vmul.f32 %v322_v3, %v322_v3  ;;  %v485_v3 = vmul.f32 %v325_v44, %v325_v44 }
  0x6f   : > { %352 = vadd.xlane.f32.xlu0 %v351_v29  ;;  %v2094_v29 = vld [vmem:[#allocation6 + $0x50] ss:$8 sps:$4 sm:$0xff]  }
  0x70   : > { %1324 = vmatpush1.bf16.msra.mxu0 %v2088_v7  ;;  %1985 = vmatpush1.bf16.msra.mxu1 %v2088_v7  ;;  %v565_v33 = vadd.f32 %v482_v28, %v481_v23  ;;  %v486_v7 = vmul.f32 %v326_v45, %v326_v45  ;;  %v332_v23 = vld [vmem:[%s2568_s29 + $0x198] sm:$0xff]  ;;  %v329_v28 = vld [vmem:[%s2568_s29 + $0x180] sm:$0xff] }
  0x71   : > { %1325 = vmatprep.subr.bf16.mxu0 %v2089_v13  ;;  %1970 = vmatprep.subr.bf16.mxu1 %v2089_v13 }
  0x72   : > { %403 = vadd.xlane.f32.xlu1 %v402_v34  ;;  %v2688_v34 = vld [vmem:[%s2568_s29 + $0x70] sm:$0xff]  ;;  %v571_v13 = vadd.f32 %v486_v7, %v485_v3 }
  0x73   : > { %400 = vadd.xlane.f32.xlu0 %v399_v38  ;;  %v2097_v38 = vld [vmem:[#allocation6 + $0x60] ss:$8 sps:$4 sm:$0xff]   ;;  %v366_v39 = vadd.f32 %v2691_v35, %v2688_v34  ;;  %v455_v48 = vmul.f32 %v2688_v34, %v2688_v34  ;;  %v2122_v7 = vld [vmem:[#allocation6 + $0xf4] ss:$8 sps:$4 sm:$0xff]  }
  0x74   : > { %1326 = vmatpush1.bf16.msra.mxu0 %v2091_v17  ;;  %1986 = vmatpush1.bf16.msra.mxu1 %v2091_v17  ;;  %v298_v17 = vld [vmem:[%s2568_s29 + $0x88] sm:$0xff] }
  0x75   : > { %1327 = vmatprep.subr.bf16.mxu0 %v2092_v21  ;;  %1971 = vmatprep.subr.bf16.mxu1 %v2092_v21  ;;  %v369_v21 = vadd.f32 %v298_v17, %v297_v16 }
  0x76   : > { %515 = vadd.xlane.f32.xlu1 %v514_v43  ;;  %v328_v43 = vld [vmem:[%s2568_s29 + $0x178] sm:$0xff] }
  0x77   : > { %512 = vadd.xlane.f32.xlu0 %v511_v46  ;;  %v2100_v46 = vld [vmem:[#allocation6 + $0x70] ss:$8 sps:$4 sm:$0xff]   ;;  %v414_v47 = vadd.f32 %v328_v43, %v327_v42  ;;  %v488_v61 = vmul.f32 %v328_v43, %v328_v43  ;;  %v458_v42 = vmul.f32 %v298_v17, %v298_v17  ;;  %v2115_v43 = vld [vmem:[#allocation6 + $0xc0] ss:$8 sps:$4 sm:$0xff]  }
  0x78   : > { %1328 = vmatpush1.bf16.msra.mxu0 %v2094_v29  ;;  %1987 = vmatpush1.bf16.msra.mxu1 %v2094_v29  ;;  %v330_v29 = vld [vmem:[%s2568_s29 + $0x188] sm:$0xff]  ;;  %v2124_v17 = vld [vmem:[#allocation6 + $0xf0] ss:$8 sps:$4 sm:$0xff]  }
  0x79   : > { %1329 = vmatprep.subr.bf16.mxu0 %v2095_v32  ;;  %1972 = vmatprep.subr.bf16.mxu1 %v2095_v32  ;;  %v574_v11 = vadd.f32 %v488_v61, %v487_v60  ;;  %v304_v60 = vld [vmem:[%s2568_s29 + $0xb8] sm:$0xff]  ;;  %v301_v61 = vld [vmem:[%s2568_s29 + $0xa0] sm:$0xff] }
  0x7a   : > { %563 = vadd.xlane.f32.xlu1 %v562_v51  ;;  %v2101_v51 = vld [vmem:[#allocation6 + $0x84] ss:$8 sps:$4 sm:$0xff]  }
  0x7b   : > { %560 = vadd.xlane.f32.xlu0 %v559_v54  ;;  %v453_v54 = vmul.f32 %v2694_v36, %v2694_v36 }
  0x7c   : > { %1330 = vmatpush1.bf16.msra.mxu0 %v2097_v38  ;;  %1988 = vmatpush1.bf16.msra.mxu1 %v2097_v38  ;;  %v460_v38 = vmul.f32 %v2719_v15, %v2719_v15 }
  0x7d   : > { %1331 = vmatprep.subr.bf16.mxu0 %v2098_v40  ;;  %1973 = vmatprep.subr.bf16.mxu1 %v2098_v40  ;;  %v523_v63 = vadd.f32 %v454_v57, %v453_v54  ;;  %v417_v40 = vadd.f32 %v330_v29, %v329_v28  ;;  %v2119_v57 = vld [vmem:[#allocation6 + $0xe4] ss:$8 sps:$4 sm:$0xff]  }
  0x7e   : > { %361 = vadd.xlane.f32.xlu1 %v360_v59  ;;  %v526_v59 = vadd.f32 %v456_v50, %v455_v48  ;;  %v489_v50 = vmul.f32 %v329_v28, %v329_v28 }
  0x7f   : > { %358 = vadd.xlane.f32.xlu0 %v357_v62  ;;  %v2104_v62 = vld [vmem:[#allocation6 + $0x94] ss:$8 sps:$4 sm:$0xff]  }
  0x80   : > { %1332 = vmatpush1.bf16.msra.mxu0 %v2100_v46  ;;  %1989 = vmatpush1.bf16.msra.mxu1 %v2100_v46  ;;  %v492_v46 = vmul.f32 %v332_v23, %v332_v23 }
  0x81   : > { %1333 = vmatprep.subr.bf16.mxu0 %v2101_v51  ;;  %1974 = vmatprep.subr.bf16.mxu1 %v2101_v51  ;;  %v490_v51 = vmul.f32 %v330_v29, %v330_v29 }
  0x82   : > { %409 = vadd.xlane.f32.xlu1 %v408_v10  ;;  %v2106_v10 = vld [vmem:[#allocation6 + $0x90] ss:$8 sps:$4 sm:$0xff]  }
  0x83   : > { %406 = vadd.xlane.f32.xlu0 %v405_v14  ;;  %v2716_v14 = vld [vmem:[%s2568_s29 + $0x90] sm:$0xff] }
  0x84   : > { %1334 = vmatpush1.bf16.msra.mxu0 %v2103_v58  ;;  %1990 = vmatpush1.bf16.msra.mxu1 %v2103_v58  ;;  %v372_v19 = vadd.f32 %v2719_v15, %v2716_v14  ;;  %v577_v58 = vadd.f32 %v490_v51, %v489_v50  ;;  %v337_v50 = vld [vmem:[%s2568_s29 + $0x1c0] sm:$0xff]  ;;  %v338_v51 = vld [vmem:[%s2568_s29 + $0x1c8] sm:$0xff] }
  0x85   : > { %1335 = vmatprep.subr.bf16.mxu0 %v2104_v62  ;;  %1975 = vmatprep.subr.bf16.mxu1 %v2104_v62  ;;  %v302_v62 = vld [vmem:[%s2568_s29 + $0xa8] sm:$0xff] }
  0x86   : > { %521 = vadd.xlane.f32.xlu1 %v520_v18  ;;  %v2109_v18 = vld [vmem:[#allocation6 + $0xa0] ss:$8 sps:$4 sm:$0xff]  }
  0x87   : > { %518 = vadd.xlane.f32.xlu0 %v517_v22  ;;  %v331_v22 = vld [vmem:[%s2568_s29 + $0x190] sm:$0xff] }
  0x88   : > { %1336 = vmatpush1.bf16.msra.mxu0 %v2106_v10  ;;  %1991 = vmatpush1.bf16.msra.mxu1 %v2106_v10  ;;  %v420_v32 = vadd.f32 %v332_v23, %v331_v22  ;;  %v491_v45 = vmul.f32 %v331_v22, %v331_v22  ;;  %v375_v10 = vadd.f32 %v302_v62, %v301_v61 }
  0x89   : > { %1337 = vmatprep.subr.bf16.mxu0 %v2107_v12  ;;  %1976 = vmatprep.subr.bf16.mxu1 %v2107_v12  ;;  %v336_v12 = vld [vmem:[%s2568_s29 + $0x1b8] sm:$0xff]  ;;  %v461_v22 = vmul.f32 %v301_v61, %v301_v61  ;;  %v462_v23 = vmul.f32 %v302_v62, %v302_v62 }
  0x8a   : > { %569 = vadd.xlane.f32.xlu1 %v568_v30  ;;  %v2112_v30 = vld [vmem:[#allocation6 + $0xb0] ss:$8 sps:$4 sm:$0xff]   ;;  %v580_v54 = vadd.f32 %v492_v46, %v491_v45 }
  0x8b   : > { %566 = vadd.xlane.f32.xlu0 %v565_v33  ;;  %v459_v33 = vmul.f32 %v2716_v14, %v2716_v14 }
  0x8c   : > { %1338 = vmatpush1.bf16.msra.mxu0 %v2109_v18  ;;  %1992 = vmatpush1.bf16.msra.mxu1 %v2109_v18 }
  0x8d   : > { %1339 = vmatprep.subr.bf16.mxu0 %v2110_v20  ;;  %1977 = vmatprep.subr.bf16.mxu1 %v2110_v20  ;;  %v532_v44 = vadd.f32 %v460_v38, %v459_v33  ;;  %v464_v20 = vmul.f32 %v304_v60, %v304_v60 }
  0x8e   : > { %367 = vadd.xlane.f32.xlu1 %v366_v39  ;;  %v2113_v39 = vld [vmem:[#allocation6 + $0xc4] ss:$8 sps:$4 sm:$0xff]  }
  0x8f   : > { %364 = vadd.xlane.f32.xlu0 %v363_v41  ;;  %v457_v41 = vmul.f32 %v297_v16, %v297_v16  ;;  %v334_v16 = vld [vmem:[%s2568_s29 + $0x1a8] sm:$0xff] }
  0x90   : > { %1340 = vmatpush1.bf16.msra.mxu0 %v2112_v30  ;;  %1993 = vmatpush1.bf16.msra.mxu1 %v2112_v30  ;;  %v496_v30 = vmul.f32 %v336_v12, %v336_v12  ;;  %v494_v38 = vmul.f32 %v334_v16, %v334_v16 }
  0x91   : > { %1341 = vmatprep.subr.bf16.mxu0 %v2113_v39  ;;  %v529_v48 = vadd.f32 %v458_v42, %v457_v41  ;;  %1978 = vmatprep.subr.bf16.mxu1 %v2113_v39  ;;  %v307_v41 = vld [vmem:[%s2568_s29 + $0xd0] sm:$0xff]  ;;  %v308_v42 = vld [vmem:[%s2568_s29 + $0xd8] sm:$0xff] }
  0x92   : > { %415 = vadd.xlane.f32.xlu1 %v414_v47  ;;  %v2116_v47 = vld [vmem:[#allocation6 + $0xd4] ss:$8 sps:$4 sm:$0xff]   ;;  %v384_v45 = vadd.f32 %v308_v42, %v307_v41 }
  0x93   : > { %412 = vadd.xlane.f32.xlu0 %v411_v53  ;;  %v2118_v53 = vld [vmem:[#allocation6 + $0xd0] ss:$8 sps:$4 sm:$0xff]  }
  0x94   : > { %1342 = vmatpush1.bf16.msra.mxu0 %v2115_v43  ;;  %1994 = vmatpush1.bf16.msra.mxu1 %v2115_v43  ;;  %v305_v43 = vld [vmem:[%s2568_s29 + $0xc0] sm:$0xff] }
  0x95   : > { %1343 = vmatprep.subr.bf16.mxu0 %v2116_v47  ;;  %1979 = vmatprep.subr.bf16.mxu1 %v2116_v47  ;;  %v339_v47 = vld [vmem:[%s2568_s29 + $0x1d0] sm:$0xff] }
  0x96   : > { %527 = vadd.xlane.f32.xlu1 %v526_v59  ;;  %v303_v59 = vld [vmem:[%s2568_s29 + $0xb0] sm:$0xff]  ;;  %v499_v62 = vmul.f32 %v339_v47, %v339_v47 }
  0x97   : > { %524 = vadd.xlane.f32.xlu0 %v523_v63  ;;  %v2121_v63 = vld [vmem:[#allocation6 + $0xe0] ss:$8 sps:$4 sm:$0xff]   ;;  %v378_v3 = vadd.f32 %v304_v60, %v303_v59 }
  0x98   : > { %1344 = vmatpush1.bf16.msra.mxu0 %v2118_v53  ;;  %1995 = vmatpush1.bf16.msra.mxu1 %v2118_v53 }
  0x99   : > { %1345 = vmatprep.subr.bf16.mxu0 %v2119_v57  ;;  %1980 = vmatprep.subr.bf16.mxu1 %v2119_v57  ;;  %v468_v57 = vmul.f32 %v308_v42, %v308_v42 }
  0x9a   : > { %575 = vadd.xlane.f32.xlu1 %v574_v11  ;;  %v335_v11 = vld [vmem:[%s2568_s29 + $0x1b0] sm:$0xff] }
  0x9b   : > { %572 = vadd.xlane.f32.xlu0 %v571_v13  ;;  %v333_v13 = vld [vmem:[%s2568_s29 + $0x1a0] sm:$0xff]  ;;  %v426_v18 = vadd.f32 %v336_v12, %v335_v11  ;;  %v495_v29 = vmul.f32 %v335_v11, %v335_v11 }
  0x9c   : > { %1346 = vmatpush1.bf16.msra.mxu0 %v2121_v63  ;;  %1996 = vmatpush1.bf16.msra.mxu1 %v2121_v63  ;;  %v493_v33 = vmul.f32 %v333_v13, %v333_v13 }
  0x9d   : > { %1347 = vmatprep.subr.bf16.mxu0 %v2122_v7  ;;  %1981 = vmatprep.subr.bf16.mxu1 %v2122_v7  ;;  %v586_v39 = vadd.f32 %v496_v30, %v495_v29  ;;  %v497_v7 = vmul.f32 %v337_v50, %v337_v50 }
  0x9e   : > { %373 = vadd.xlane.f32.xlu1 %v372_v19  ;;  %v463_v19 = vmul.f32 %v303_v59, %v303_v59  ;;  %v465_v59 = vmul.f32 %v305_v43, %v305_v43 }
  0x9f   : > { %370 = vadd.xlane.f32.xlu0 %v369_v21  ;;  %v423_v21 = vadd.f32 %v334_v16, %v333_v13  ;;  %v311_v13 = vld [vmem:[%s2568_s29 + $0xf0] sm:$0xff]  ;;  %v312_v16 = vld [vmem:[%s2568_s29 + $0xf8] sm:$0xff] }
  0xa0   : > { %1348 = vmatpush1.bf16.msra.mxu0 %v2124_v17  ;;  %v538_v28 = vadd.f32 %v464_v20, %v463_v19  ;;  %1997 = vmatpush1.bf16.msra.mxu1 %v2124_v17  ;;  %v309_v17 = vld [vmem:[%s2568_s29 + $0xe0] sm:$0xff]  ;;  %v390_v19 = vadd.f32 %v312_v16, %v311_v13  ;;  %v471_v30 = vmul.f32 %v311_v13, %v311_v13  ;;  %v827_v13 = vlaneseq }
  0xa2   : > { %421 = vadd.xlane.f32.xlu1 %v420_v32  ;;  %v535_v32 = vadd.f32 %v462_v23, %v461_v22  ;;  %v344_v22 = vld [vmem:[%s2568_s29 + $0x1f8] sm:$0xff]  ;;  %v341_v23 = vld [vmem:[%s2568_s29 + $0x1e0] sm:$0xff] }
  0xa3   : > { %418 = vadd.xlane.f32.xlu0 %v417_v40  ;;  %v583_v40 = vadd.f32 %v494_v38, %v493_v33  ;;  %v469_v38 = vmul.f32 %v309_v17, %v309_v17  ;;  %v504_v42 = vmul.f32 %v344_v22, %v344_v22 }
  0xa6   : > { %533 = vadd.xlane.f32.xlu1 %v532_v44  ;;  %v306_v44 = vld [vmem:[%s2568_s29 + $0xc8] sm:$0xff] }
  0xa7   : > { %530 = vadd.xlane.f32.xlu0 %v529_v48  ;;  %v381_v46 = vadd.f32 %v306_v44, %v305_v43  ;;  %v340_v48 = vld [vmem:[%s2568_s29 + $0x1d8] sm:$0xff]  ;;  %v466_v60 = vmul.f32 %v306_v44, %v306_v44  ;;  %v501_v44 = vmul.f32 %v341_v23, %v341_v23 }
  0xa8   : > { %v432_v53 = vadd.f32 %v340_v48, %v339_v47  ;;  %v500_v63 = vmul.f32 %v340_v48, %v340_v48 }
  0xaa   : > { %581 = vadd.xlane.f32.xlu1 %v580_v54  ;;  %v467_v54 = vmul.f32 %v307_v41, %v307_v41  ;;  %v592_v11 = vadd.f32 %v500_v63, %v499_v62 }
  0xab   : > { %578 = vadd.xlane.f32.xlu0 %v577_v58  ;;  %v429_v58 = vadd.f32 %v338_v51, %v337_v50 }
  0xac   : > { %v544_v61 = vadd.f32 %v468_v57, %v467_v54 }
  0xae   : > { %379 = vadd.xlane.f32.xlu1 %v378_v3  ;;  %v541_v3 = vadd.f32 %v466_v60, %v465_v59 }
  0xaf   : > { %376 = vadd.xlane.f32.xlu0 %v375_v10  ;;  %v498_v10 = vmul.f32 %v338_v51, %v338_v51 }
  0xb1   : > { %v589_v12 = vadd.f32 %v498_v10, %v497_v7 }
  0xb2   : > { %427 = vadd.xlane.f32.xlu1 %v426_v18  ;;  %v310_v18 = vld [vmem:[%s2568_s29 + $0xe8] sm:$0xff] }
  0xb3   : > { %424 = vadd.xlane.f32.xlu0 %v423_v21  ;;  %v387_v20 = vadd.f32 %v310_v18, %v309_v17  ;;  %v343_v21 = vld [vmem:[%s2568_s29 + $0x1f0] sm:$0xff] }
  0xb4   : > { %v438_v29 = vadd.f32 %v344_v22, %v343_v21  ;;  %v503_v41 = vmul.f32 %v343_v21, %v343_v21 }
  0xb6   : > { %539 = vadd.xlane.f32.xlu1 %v538_v28  ;;  %v342_v28 = vld [vmem:[%s2568_s29 + $0x1e8] sm:$0xff] }
  0xb7   : > { %536 = vadd.xlane.f32.xlu0 %v535_v32  ;;  %v472_v32 = vmul.f32 %v312_v16, %v312_v16  ;;  %v435_v33 = vadd.f32 %v342_v28, %v341_v23 }
  0xba   : > { %587 = vadd.xlane.f32.xlu1 %v586_v39  ;;  %v470_v39 = vmul.f32 %v310_v18, %v310_v18 }
  0xbb   : > { %584 = vadd.xlane.f32.xlu0 %v583_v40  ;;  %v550_v40 = vadd.f32 %v472_v32, %v471_v30 }
  0xbc   : > { %v547_v43 = vadd.f32 %v470_v39, %v469_v38 }
  0xbe   : > { %385 = vadd.xlane.f32.xlu1 %v384_v45  ;;  %v502_v45 = vmul.f32 %v342_v28, %v342_v28 }
  0xbf   : > { %382 = vadd.xlane.f32.xlu0 %v381_v46  ;;  %v598_v46 = vadd.f32 %v504_v42, %v503_v41 }
  0xc0   : > { %v595_v47 = vadd.f32 %v502_v45, %v501_v44 }
  0xc2   : > { %433 = vadd.xlane.f32.xlu1 %v432_v53 }
  0xc3   : > { %430 = vadd.xlane.f32.xlu0 %v429_v58 }
  0xc6   : > { %545 = vadd.xlane.f32.xlu1 %v544_v61 }
  0xc7   : > { %542 = vadd.xlane.f32.xlu0 %v541_v3 }
  0xca   : > { %593 = vadd.xlane.f32.xlu1 %v592_v11 }
  0xcb   : > { %590 = vadd.xlane.f32.xlu0 %v589_v12 }
  0xce   : > { %391 = vadd.xlane.f32.xlu1 %v390_v19 }
  0xcf   : > { %388 = vadd.xlane.f32.xlu0 %v387_v20 }
  0xd2   : > { %439 = vadd.xlane.f32.xlu1 %v438_v29 }
  0xd3   : > { %436 = vadd.xlane.f32.xlu0 %v435_v33  ;;  %v2773_v33 = vshrl.u32 %v827_v13, 7 }
  0xd5   : > { %v829_v44 = vsub.s32 0, %v2773_v33  ;;  %v833_v45 = vsub.s32 1, %v2773_v33 }
  0xd6   : > { %551 = vadd.xlane.f32.xlu1 %v550_v40 }
  0xd7   : > { %548 = vadd.xlane.f32.xlu0 %v547_v43 }
  0xda   : > { %599 = vadd.xlane.f32.xlu1 %v598_v46 }
  0xdb   : > { %596 = vadd.xlane.f32.xlu0 %v595_v47 }
  0xeb   : > { %v395_v48 = vpop.xlane.xlu1 %394 }
  0xec   : > { %v347_v50 = vpop.xlane.xlu0 %346  ;;  %v2765_v63 = vmul.f32 0.00390625, %v395_v48  ;;  %v825_v48 = vld [vmem:[%s3358_s3] sm:$0x3] }
  0xed   : > { %v2757_v54 = vmul.f32 0.00390625, %v347_v50 }
  0xee   : > { %v681_v21 = vmul.f32 %v2765_v63, %v2765_v63 }
  0xef   : > { %v398_v51 = vpop.xlane.xlu1 %397  ;;  %v665_v3 = vmul.f32 %v2757_v54, %v2757_v54  ;;  %v902_v13 = vsub.f32 %v2590_v4, %v2757_v54 }
  0xf0   : > { %v350_v53 = vpop.xlane.xlu0 %349  ;;  %v2761_v59 = vmul.f32 0.00390625, %v398_v51 }
  0xf1   : > { %v2759_v57 = vmul.f32 0.00390625, %v350_v53 }
  0xf2   : > { %v682_v17 = vmul.f32 %v2761_v59, %v2761_v59 }
  0xf3   : > { %v510_v58 = vpop.xlane.xlu1 %509  ;;  %v666_v61 = vmul.f32 %v2759_v57, %v2759_v57 }
  0xf4   : > { %v634_v60 = vmul.f32 0.00390625, %v510_v58  ;;  %v507_v62 = vpop.xlane.xlu0 %506 }
  0xf5   : > { %v633_v7 = vmul.f32 0.00390625, %v507_v62 }
  0xf6   : > { %v698_v10 = vsub.f32 %v634_v60, %v666_v61  ;;  %v2790_v60 = vrot.slane %v825_v48, %v829_v44  ;;  %v2794_v61 = vrot.slane %v825_v48, %v833_v45 }
  0xf7   : > { %v697_v11 = vsub.f32 %v633_v7, %v665_v3  ;;  %v558_v12 = vpop.xlane.xlu1 %557 }
  0xf8   : > { %v730_v16 = vmax.f32 %v698_v10, 0.0  ;;  %v650_v18 = vmul.f32 0.00390625, %v558_v12  ;;  %v555_v19 = vpop.xlane.xlu0 %554  ;;  %v901_v10 = vsub.f32 %v2585_v2, %v2757_v54 }
  0xf9   : > { %v729_v20 = vmax.f32 %v697_v11, 0.0  ;;  %v649_v22 = vmul.f32 0.00390625, %v555_v19 }
  0xfa   : > { %v762_v23 = vadd.f32 1e-05, %v730_v16  ;;  %v714_v28 = vsub.f32 %v650_v18, %v682_v17  ;;  %v903_v17 = vsub.f32 %v2601_v8, %v2759_v57 }
  0xfb   : > { %v761_v29 = vadd.f32 1e-05, %v729_v20  ;;  %v713_v30 = vsub.f32 %v649_v22, %v681_v21  ;;  %v356_v32 = vpop.xlane.xlu1 %355  ;;  %v904_v20 = vsub.f32 %v2604_v9, %v2759_v57 }
  0xfc   : > { %2125 = vrsqrt.f32 %v762_v23  ;;  %v746_v38 = vmax.f32 %v714_v28, 0.0  ;;  %v353_v39 = vpop.xlane.xlu0 %352  ;;  %v2777_v46 = vmul.f32 0.00390625, %v356_v32 }
  0xfd   : > { %2127 = vrsqrt.f32 %v761_v29  ;;  %v745_v40 = vmax.f32 %v713_v30, 0.0  ;;  %v2782_v50 = vmul.f32 0.00390625, %v353_v39 }
  0xfe   : > { %v778_v41 = vadd.f32 1e-05, %v746_v38  ;;  %v668_v62 = vmul.f32 %v2777_v46, %v2777_v46 }
  0xff   : > { %v777_v42 = vadd.f32 1e-05, %v745_v40  ;;  %v404_v43 = vpop.xlane.xlu1 %403  ;;  %v667_v11 = vmul.f32 %v2782_v50, %v2782_v50 }
 0x100   : > { %2129 = vrsqrt.f32 %v778_v41  ;;  %v401_v47 = vpop.xlane.xlu0 %400  ;;  %v2784_v51 = vmul.f32 0.00390625, %v404_v43 }
 0x101   : > { %2131 = vrsqrt.f32 %v777_v42  ;;  %v2786_v53 = vmul.f32 0.00390625, %v401_v47 }
 0x102   : > { %v684_v19 = vmul.f32 %v2784_v51, %v2784_v51 }
 0x103   : > { %v516_v58 = vpop.xlane.xlu1 %515  ;;  %v683_v23 = vmul.f32 %v2786_v53, %v2786_v53 }
 0x104   : > { %v636_v3 = vmul.f32 0.00390625, %v516_v58  ;;  %v513_v7 = vpop.xlane.xlu0 %512 }
 0x105   : > { %v635_v12 = vmul.f32 0.00390625, %v513_v7 }
 0x106   : > { %v2126_v16 = vpop.eup %2125  ;;  %v700_v18 = vsub.f32 %v636_v3, %v668_v62 }
 0x107   : > { %v2128_v21 = vpop.eup %2127  ;;  %v699_v2 = vsub.f32 %v635_v12, %v667_v11  ;;  %v564_v22 = vpop.xlane.xlu1 %563  ;;  %v840_v28 = vmul.f32 %v2126_v16, %v2794_v61  ;;  %v839_v4 = vmul.f32 %v2126_v16, %v2790_v60 }
 0x108   : > { %v732_v54 = vmax.f32 %v700_v18, 0.0  ;;  %v652_v29 = vmul.f32 0.00390625, %v564_v22  ;;  %v561_v8 = vpop.xlane.xlu0 %560  ;;  %v838_v30 = vmul.f32 %v2128_v21, %v2794_v61  ;;  %v837_v32 = vmul.f32 %v2128_v21, %v2790_v60 }
 0x109   : > { %v731_v38 = vmax.f32 %v699_v2, 0.0  ;;  %v651_v39 = vmul.f32 0.00390625, %v561_v8  ;;  %v968_v9 = vmul.f32 %v904_v20, %v840_v28  ;;  %v967_v57 = vmul.f32 %v903_v17, %v839_v4 }
 0x10a   : > { %v2130_v40 = vpop.eup %2129  ;;  %v764_v41 = vadd.f32 1e-05, %v732_v54  ;;  %v716_v42 = vsub.f32 %v652_v29, %v684_v19  ;;  %v966_v43 = vmul.f32 %v902_v13, %v838_v30  ;;  %v965_v47 = vmul.f32 %v901_v10, %v837_v32 }
 0x10b   : > { %v2132_v48 = vpop.eup %2131  ;;  %v763_v58 = vadd.f32 1e-05, %v731_v38  ;;  %v715_v62 = vsub.f32 %v651_v39, %v683_v23  ;;  %v362_v3 = vpop.xlane.xlu1 %361  ;;  %v872_v7 = vmul.f32 %v2130_v40, %v2794_v61  ;;  %v936_v18 = vsub.f32 %v2596_v6, %v2761_v59 }
 0x10c   : > { %2133 = vrsqrt.f32 %v764_v41  ;;  %v748_v11 = vmax.f32 %v716_v42, 0.0  ;;  %v359_v12 = vpop.xlane.xlu0 %358  ;;  %v1030_v16 = vpack.c.bf16 %v968_v9, %v966_v43  ;;  %v1029_v20 = vpack.c.bf16 %v967_v57, %v965_v47 }
 0x10d   : > { %2135 = vrsqrt.f32 %v763_v58  ;;  %v747_v17 = vmax.f32 %v715_v62, 0.0  ;;  %v871_v19 = vmul.f32 %v2130_v40, %v2790_v60  ;;  %v870_v10 = vmul.f32 %v2132_v48, %v2794_v61 }
 0x10e   : > { %v780_v13 = vadd.f32 1e-05, %v748_v11  ;;  %1349 = vmatprep.mubr.bf16.mxu0 %v1030_v16  ;;  %v934_v21 = vsub.f32 %v2582_v1, %v2765_v63  ;;  %v933_v2 = vsub.f32 %v2579_v0, %v2765_v63  ;;  %v935_v22 = vsub.f32 %v2593_v5, %v2761_v59 }
 0x10f   : > { %v779_v23 = vadd.f32 1e-05, %v747_v17  ;;  %1350 = vmatmul.mubr.bf16.vlgmr.msra.gmra.mrb[0].mxu0 %v1029_v20  ;;  %v410_v6 = vpop.xlane.xlu1 %409  ;;  %v1000_v28 = vmul.f32 %v936_v18, %v872_v7  ;;  %v2827_v4 = vmul.f32 0.00390625, %v362_v3  ;;  %v869_v8 = vmul.f32 %v2132_v48, %v2790_v60 }
 0x110   : > { %2137 = vrsqrt.f32 %v780_v13  ;;  %v407_v54 = vpop.xlane.xlu0 %406  ;;  %v998_v29 = vmul.f32 %v934_v21, %v870_v10  ;;  %v2830_v30 = vmul.f32 0.00390625, %v359_v12  ;;  %v999_v1 = vmul.f32 %v935_v22, %v871_v19 }
 0x111   : > { %2139 = vrsqrt.f32 %v779_v23  ;;  %v2832_v32 = vmul.f32 0.00390625, %v410_v6  ;;  %v997_v63 = vmul.f32 %v933_v2, %v869_v8  ;;  %v2834_v5 = vmul.f32 0.00390625, %v407_v54 }
 0x112   : > { %v1046_v0 = vpack.c.bf16 %v1000_v28, %v998_v29  ;;  %v670_v39 = vmul.f32 %v2827_v4, %v2827_v4  ;;  %v907_v40 = vsub.f32 %v2627_v24, %v2777_v46  ;;  %v908_v41 = vsub.f32 %v2630_v25, %v2777_v46 }
 0x113   : > { %v522_v59 = vpop.xlane.xlu1 %521  ;;  %v1045_v38 = vpack.c.bf16 %v999_v1, %v997_v63  ;;  %v669_v42 = vmul.f32 %v2830_v30, %v2830_v30  ;;  %v905_v48 = vsub.f32 %v2633_v26, %v2782_v50  ;;  %v906_v58 = vsub.f32 %v2636_v27, %v2782_v50 }
 0x114   : > { %1429 = vmatprep.mubr.bf16.mxu1 %v1046_v0  ;;  %v638_v9 = vmul.f32 0.00390625, %v522_v59  ;;  %v519_v57 = vpop.xlane.xlu0 %518  ;;  %v686_v3 = vmul.f32 %v2832_v32, %v2832_v32  ;;  %v685_v25 = vmul.f32 %v2834_v5, %v2834_v5  ;;  %v940_v1 = vsub.f32 %v2644_v31, %v2784_v51 }
 0x115   : > { %v637_v43 = vmul.f32 0.00390625, %v519_v57  ;;  %1430 = vmatmul.mubr.bf16.vlgmr.msra.gmra.mrb[0].mxu1 %v1045_v38  ;;  %v2189_v57 = vld [vmem:[%s2568_s29 + $0x128] sm:$0xff] }
 0x116   : > { %v2134_v47 = vpop.eup %2133  ;;  %v702_v62 = vsub.f32 %v638_v9, %v670_v39 }
 0x117   : > { %v2136_v24 = vpop.eup %2135  ;;  %v701_v7 = vsub.f32 %v637_v43, %v669_v42  ;;  %v570_v11 = vpop.xlane.xlu1 %569  ;;  %v844_v46 = vmul.f32 %v2134_v47, %v2794_v61  ;;  %v843_v12 = vmul.f32 %v2134_v47, %v2790_v60  ;;  %v2190_v43 = vld [vmem:[%s2568_s29 + $0x130] sm:$0xff]  ;;  %v2191_v47 = vld [vmem:[%s2568_s29 + $0x120] sm:$0xff] }
 0x118   : > { %v734_v16 = vmax.f32 %v702_v62, 0.0  ;;  %v654_v26 = vmul.f32 0.00390625, %v570_v11  ;;  %v567_v18 = vpop.xlane.xlu0 %566  ;;  %v842_v27 = vmul.f32 %v2136_v24, %v2794_v61  ;;  %v841_v50 = vmul.f32 %v2136_v24, %v2790_v60 }
 0x119   : > { %v733_v17 = vmax.f32 %v701_v7, 0.0  ;;  %v653_v20 = vmul.f32 0.00390625, %v567_v18  ;;  %v972_v19 = vmul.f32 %v908_v41, %v844_v46  ;;  %v971_v13 = vmul.f32 %v907_v40, %v843_v12 }
 0x11a   : > { %v2138_v10 = vpop.eup %2137  ;;  %v766_v21 = vadd.f32 1e-05, %v734_v16  ;;  %v718_v2 = vsub.f32 %v654_v26, %v686_v3  ;;  %v970_v22 = vmul.f32 %v906_v58, %v842_v27  ;;  %v969_v23 = vmul.f32 %v905_v48, %v841_v50 }
 0x11b   : > { %v2140_v6 = vpop.eup %2139  ;;  %v765_v28 = vadd.f32 1e-05, %v733_v17  ;;  %v717_v54 = vsub.f32 %v653_v20, %v685_v25  ;;  %v368_v29 = vpop.xlane.xlu1 %367  ;;  %v876_v8 = vmul.f32 %v2138_v10, %v2794_v61  ;;  %v875_v9 = vmul.f32 %v2138_v10, %v2790_v60 }
 0x11c   : > { %2141 = vrsqrt.f32 %v766_v21  ;;  %v750_v0 = vmax.f32 %v718_v2, 0.0  ;;  %v365_v63 = vpop.xlane.xlu0 %364  ;;  %v1032_v59 = vpack.c.bf16 %v972_v19, %v970_v22  ;;  %v1031_v39 = vpack.c.bf16 %v971_v13, %v969_v23 }
 0x11d   : > { %2143 = vrsqrt.f32 %v765_v28  ;;  %v749_v38 = vmax.f32 %v717_v54, 0.0  ;;  %v938_v40 = vsub.f32 %v2189_v57, %v2786_v53  ;;  %v874_v42 = vmul.f32 %v2140_v6, %v2794_v61 }
 0x11e   : > { %v782_v41 = vadd.f32 1e-05, %v750_v0  ;;  %1359 = vmatprep.mubr.bf16.mxu0 %v1032_v59  ;;  %v939_v31 = vsub.f32 %v2190_v43, %v2784_v51  ;;  %v937_v48 = vsub.f32 %v2191_v47, %v2786_v53  ;;  %v1004_v3 = vmul.f32 %v940_v1, %v876_v8 }
 0x11f   : > { %v781_v58 = vadd.f32 1e-05, %v749_v38  ;;  %1360 = vmatmul.mubr.bf16.gmra.mrb[4].mxu0 %v1031_v39  ;;  %v416_v62 = vpop.xlane.xlu1 %415  ;;  %v2867_v24 = vmul.f32 0.00390625, %v368_v29  ;;  %v1002_v11 = vmul.f32 %v938_v40, %v874_v42  ;;  %v873_v25 = vmul.f32 %v2140_v6, %v2790_v60 }
 0x120   : > { %2145 = vrsqrt.f32 %v782_v41  ;;  %v413_v7 = vpop.xlane.xlu0 %412  ;;  %v2870_v46 = vmul.f32 0.00390625, %v365_v63  ;;  %v1003_v12 = vmul.f32 %v939_v31, %v875_v9  ;;  %v2872_v16 = vmul.f32 0.00390625, %v416_v62  ;;  %v2192_v62 = vld [vmem:[%s2568_s29 + $0x158] sm:$0xff] }
 0x121   : > { %2147 = vrsqrt.f32 %v781_v58  ;;  %v1048_v51 = vpack.c.bf16 %v1004_v3, %v1002_v11  ;;  %v1001_v26 = vmul.f32 %v937_v48, %v873_v25  ;;  %v2874_v53 = vmul.f32 0.00390625, %v413_v7 }
 0x122   : > { %v672_v50 = vmul.f32 %v2867_v24, %v2867_v24  ;;  %v911_v19 = vsub.f32 %v2660_v49, %v2827_v4  ;;  %v912_v13 = vsub.f32 %v2663_v52, %v2827_v4  ;;  %v671_v10 = vmul.f32 %v2870_v46, %v2870_v46 }
 0x123   : > { %v528_v18 = vpop.xlane.xlu1 %527  ;;  %1439 = vmatprep.mubr.bf16.mxu1 %v1048_v51  ;;  %v1047_v27 = vpack.c.bf16 %v1003_v12, %v1001_v26  ;;  %v909_v22 = vsub.f32 %v2666_v55, %v2830_v30  ;;  %v910_v23 = vsub.f32 %v2669_v56, %v2830_v30  ;;  %v688_v28 = vmul.f32 %v2872_v16, %v2872_v16 }
 0x124   : > { %v640_v17 = vmul.f32 0.00390625, %v528_v18  ;;  %v525_v20 = vpop.xlane.xlu0 %524  ;;  %v687_v52 = vmul.f32 %v2874_v53, %v2874_v53  ;;  %v944_v3 = vsub.f32 %v2192_v62, %v2832_v32  ;;  %v2193_v18 = vld [vmem:[%s2568_s29 + $0x148] sm:$0xff] }
 0x125   : > { %v639_v21 = vmul.f32 0.00390625, %v525_v20  ;;  %1440 = vmatmul.mubr.bf16.gmra.mrb[4].mxu1 %v1047_v27  ;;  %v942_v27 = vsub.f32 %v2193_v18, %v2834_v5  ;;  %v2194_v20 = vld [vmem:[%s2568_s29 + $0x150] sm:$0xff] }
 0x126   : > { %v2142_v2 = vpop.eup %2141  ;;  %v704_v6 = vsub.f32 %v640_v17, %v672_v50 }
 0x127   : > { %v2144_v49 = vpop.eup %2143  ;;  %v703_v54 = vsub.f32 %v639_v21, %v671_v10  ;;  %v576_v29 = vpop.xlane.xlu1 %575  ;;  %v848_v4 = vmul.f32 %v2142_v2, %v2794_v61  ;;  %v847_v8 = vmul.f32 %v2142_v2, %v2790_v60 }
 0x128   : > { %v736_v1 = vmax.f32 %v704_v6, 0.0  ;;  %v656_v55 = vmul.f32 0.00390625, %v576_v29  ;;  %v573_v0 = vpop.xlane.xlu0 %572  ;;  %v846_v56 = vmul.f32 %v2144_v49, %v2794_v61  ;;  %v845_v30 = vmul.f32 %v2144_v49, %v2790_v60 }
 0x129   : > { %v735_v63 = vmax.f32 %v703_v54, 0.0  ;;  %v655_v59 = vmul.f32 0.00390625, %v573_v0  ;;  %v976_v38 = vmul.f32 %v912_v13, %v848_v4  ;;  %v975_v39 = vmul.f32 %v911_v19, %v847_v8  ;;  %v2195_v13 = vld [vmem:[%s2568_s29 + $0x140] sm:$0xff] }
 0x12a   : > { %v2146_v9 = vpop.eup %2145  ;;  %v768_v57 = vadd.f32 1e-05, %v736_v1  ;;  %v720_v40 = vsub.f32 %v656_v55, %v688_v28  ;;  %v974_v41 = vmul.f32 %v910_v23, %v846_v56  ;;  %v973_v42 = vmul.f32 %v909_v22, %v845_v30 }
 0x12b   : > { %v2148_v43 = vpop.eup %2147  ;;  %v767_v31 = vadd.f32 1e-05, %v735_v63  ;;  %v719_v47 = vsub.f32 %v655_v59, %v687_v52  ;;  %v374_v48 = vpop.xlane.xlu1 %373  ;;  %v880_v58 = vmul.f32 %v2146_v9, %v2794_v61  ;;  %v879_v26 = vmul.f32 %v2146_v9, %v2790_v60 }
 0x12c   : > { %2149 = vrsqrt.f32 %v768_v57  ;;  %v752_v7 = vmax.f32 %v720_v40, 0.0  ;;  %v371_v11 = vpop.xlane.xlu0 %370  ;;  %v1034_v25 = vpack.c.bf16 %v976_v38, %v974_v41  ;;  %v1033_v51 = vpack.c.bf16 %v975_v39, %v973_v42 }
 0x12d   : > { %2151 = vrsqrt.f32 %v767_v31  ;;  %v751_v12 = vmax.f32 %v719_v47, 0.0  ;;  %v878_v17 = vmul.f32 %v2148_v43, %v2794_v61  ;;  %v943_v19 = vsub.f32 %v2194_v20, %v2832_v32 }
 0x12e   : > { %v784_v50 = vadd.f32 1e-05, %v752_v7  ;;  %1369 = vmatprep.mubr.bf16.mxu0 %v1034_v25  ;;  %v941_v10 = vsub.f32 %v2195_v13, %v2834_v5  ;;  %v1008_v22 = vmul.f32 %v944_v3, %v880_v58  ;;  %v2907_v23 = vmul.f32 0.00390625, %v374_v48 }
 0x12f   : > { %v783_v21 = vadd.f32 1e-05, %v751_v12  ;;  %1370 = vmatmul.mubr.bf16.gmra.mrb[8].mxu0 %v1033_v51  ;;  %v422_v2 = vpop.xlane.xlu1 %421  ;;  %v1006_v28 = vmul.f32 %v942_v27, %v878_v17  ;;  %v877_v49 = vmul.f32 %v2148_v43, %v2790_v60  ;;  %v2910_v54 = vmul.f32 0.00390625, %v371_v11 }
 0x130   : > { %2153 = vrsqrt.f32 %v784_v50  ;;  %v419_v6 = vpop.xlane.xlu0 %418  ;;  %v1007_v29 = vmul.f32 %v943_v19, %v879_v26  ;;  %v2912_v52 = vmul.f32 0.00390625, %v422_v2  ;;  %v674_v55 = vmul.f32 %v2907_v23, %v2907_v23  ;;  %v2196_v19 = vld [vmem:[%s2568_s29 + $0x178] sm:$0xff] }
 0x131   : > { %2155 = vrsqrt.f32 %v783_v21  ;;  %v1050_v32 = vpack.c.bf16 %v1008_v22, %v1006_v28  ;;  %v1005_v4 = vmul.f32 %v941_v10, %v877_v49  ;;  %v2914_v5 = vmul.f32 0.00390625, %v419_v6  ;;  %v2197_v49 = vld [vmem:[%s2568_s29 + $0x168] sm:$0xff] }
 0x132   : > { %v915_v30 = vsub.f32 %v2688_v34, %v2867_v24  ;;  %v916_v63 = vsub.f32 %v2691_v35, %v2867_v24  ;;  %v673_v59 = vmul.f32 %v2910_v54, %v2910_v54  ;;  %v913_v9 = vsub.f32 %v2694_v36, %v2870_v46 }
 0x133   : > { %v534_v8 = vpop.xlane.xlu1 %533  ;;  %1449 = vmatprep.mubr.bf16.mxu1 %v1050_v32  ;;  %v1049_v1 = vpack.c.bf16 %v1007_v29, %v1005_v4  ;;  %v914_v57 = vsub.f32 %v2697_v37, %v2870_v46  ;;  %v690_v41 = vmul.f32 %v2912_v52, %v2912_v52  ;;  %v689_v35 = vmul.f32 %v2914_v5, %v2914_v5 }
 0x134   : > { %v642_v0 = vmul.f32 0.00390625, %v534_v8  ;;  %v531_v56 = vpop.xlane.xlu0 %530  ;;  %v948_v13 = vsub.f32 %v2196_v19, %v2872_v16  ;;  %v946_v29 = vsub.f32 %v2197_v49, %v2874_v53  ;;  %v2198_v8 = vld [vmem:[%s2568_s29 + $0x170] sm:$0xff] }
 0x135   : > { %v641_v38 = vmul.f32 0.00390625, %v531_v56  ;;  %1450 = vmatmul.mubr.bf16.gmra.mrb[8].mxu1 %v1049_v1  ;;  %v947_v1 = vsub.f32 %v2198_v8, %v2872_v16 }
 0x136   : > { %v2150_v39 = vpop.eup %2149  ;;  %v706_v40 = vsub.f32 %v642_v0, %v674_v55  ;;  %v2199_v55 = vld [vmem:[%s2568_s29 + $0x160] sm:$0xff] }
 0x137   : > { %v2152_v34 = vpop.eup %2151  ;;  %v705_v42 = vsub.f32 %v641_v38, %v673_v59  ;;  %v582_v43 = vpop.xlane.xlu1 %581  ;;  %v852_v24 = vmul.f32 %v2150_v39, %v2794_v61  ;;  %v851_v31 = vmul.f32 %v2150_v39, %v2790_v60  ;;  %v945_v0 = vsub.f32 %v2199_v55, %v2874_v53 }
 0x138   : > { %v738_v47 = vmax.f32 %v706_v40, 0.0  ;;  %v658_v36 = vmul.f32 0.00390625, %v582_v43  ;;  %v579_v48 = vpop.xlane.xlu0 %578  ;;  %v850_v37 = vmul.f32 %v2152_v34, %v2794_v61  ;;  %v849_v46 = vmul.f32 %v2152_v34, %v2790_v60 }
 0x139   : > { %v737_v58 = vmax.f32 %v705_v42, 0.0  ;;  %v657_v62 = vmul.f32 0.00390625, %v579_v48  ;;  %v980_v3 = vmul.f32 %v916_v63, %v852_v24  ;;  %v979_v7 = vmul.f32 %v915_v30, %v851_v31 }
 0x13a   : > { %v2154_v11 = vpop.eup %2153  ;;  %v770_v25 = vadd.f32 1e-05, %v738_v47  ;;  %v722_v12 = vsub.f32 %v658_v36, %v690_v41  ;;  %v978_v51 = vmul.f32 %v914_v57, %v850_v37  ;;  %v977_v26 = vmul.f32 %v913_v9, %v849_v46 }
 0x13b   : > { %v2156_v18 = vpop.eup %2155  ;;  %v769_v27 = vadd.f32 1e-05, %v737_v58  ;;  %v721_v50 = vsub.f32 %v657_v62, %v689_v35  ;;  %v380_v17 = vpop.xlane.xlu1 %379  ;;  %v884_v20 = vmul.f32 %v2154_v11, %v2794_v61  ;;  %v883_v28 = vmul.f32 %v2154_v11, %v2790_v60  ;;  %v2200_v58 = vld [vmem:[%s2568_s29 + $0x80] sm:$0xff] }
 0x13c   : > { %2157 = vrsqrt.f32 %v770_v25  ;;  %v754_v10 = vmax.f32 %v722_v12, 0.0  ;;  %v377_v21 = vpop.xlane.xlu0 %376  ;;  %v1036_v2 = vpack.c.bf16 %v980_v3, %v978_v51  ;;  %v1035_v6 = vpack.c.bf16 %v979_v7, %v977_v26  ;;  %v2201_v3 = vld [vmem:[%s2568_s29 + $0x88] sm:$0xff] }
 0x13d   : > { %2159 = vrsqrt.f32 %v769_v27  ;;  %v753_v22 = vmax.f32 %v721_v50, 0.0  ;;  %v882_v4 = vmul.f32 %v2156_v18, %v2794_v61  ;;  %v1012_v63 = vmul.f32 %v948_v13, %v884_v20 }
 0x13e   : > { %v786_v32 = vadd.f32 1e-05, %v754_v10  ;;  %1379 = vmatprep.mubr.bf16.mxu0 %v1036_v2  ;;  %v2947_v59 = vmul.f32 0.00390625, %v380_v17  ;;  %v881_v9 = vmul.f32 %v2156_v18, %v2790_v60  ;;  %v2950_v57 = vmul.f32 0.00390625, %v377_v21 }
 0x13f   : > { %v785_v56 = vadd.f32 1e-05, %v753_v22  ;;  %1380 = vmatmul.mubr.bf16.gmra.mrb[12].mxu0 %v1035_v6  ;;  %v428_v30 = vpop.xlane.xlu1 %427  ;;  %v1010_v39 = vmul.f32 %v946_v29, %v882_v4  ;;  %v1011_v40 = vmul.f32 %v947_v1, %v883_v28  ;;  %v919_v47 = vsub.f32 %v2716_v14, %v2907_v23  ;;  %v2202_v1 = vld [vmem:[%s2568_s29 + $0x198] sm:$0xff] }
 0x140   : > { %2161 = vrsqrt.f32 %v786_v32  ;;  %v425_v38 = vpop.xlane.xlu0 %424  ;;  %v2952_v16 = vmul.f32 0.00390625, %v428_v30  ;;  %v1009_v53 = vmul.f32 %v945_v0, %v881_v9  ;;  %v676_v35 = vmul.f32 %v2947_v59, %v2947_v59  ;;  %v2203_v9 = vld [vmem:[%s2568_s29 + $0x188] sm:$0xff] }
 0x141   : > { %2163 = vrsqrt.f32 %v785_v56  ;;  %v1052_v41 = vpack.c.bf16 %v1012_v63, %v1010_v39  ;;  %v2954_v34 = vmul.f32 0.00390625, %v425_v38  ;;  %v920_v36 = vsub.f32 %v2719_v15, %v2907_v23 }
 0x142   : > { %v1051_v43 = vpack.c.bf16 %v1011_v40, %v1009_v53  ;;  %v675_v48 = vmul.f32 %v2950_v57, %v2950_v57  ;;  %v917_v62 = vsub.f32 %v2200_v58, %v2910_v54  ;;  %v918_v7 = vsub.f32 %v2201_v3, %v2910_v54 }
 0x143   : > { %v540_v42 = vpop.xlane.xlu1 %539  ;;  %1459 = vmatprep.mubr.bf16.mxu1 %v1052_v41  ;;  %v692_v25 = vmul.f32 %v2952_v16, %v2952_v16  ;;  %v691_v15 = vmul.f32 %v2954_v34, %v2954_v34  ;;  %v952_v55 = vsub.f32 %v2202_v1, %v2912_v52  ;;  %v950_v40 = vsub.f32 %v2203_v9, %v2914_v5 }
 0x144   : > { %v644_v24 = vmul.f32 0.00390625, %v540_v42  ;;  %v537_v31 = vpop.xlane.xlu0 %536  ;;  %1460 = vmatmul.mubr.bf16.gmra.mrb[12].mxu1 %v1051_v43  ;;  %v2204_v42 = vld [vmem:[%s2568_s29 + $0x190] sm:$0xff] }
 0x145   : > { %v643_v37 = vmul.f32 0.00390625, %v537_v31  ;;  %v951_v43 = vsub.f32 %v2204_v42, %v2912_v52 }
 0x146   : > { %v2158_v46 = vpop.eup %2157  ;;  %v708_v11 = vsub.f32 %v644_v24, %v676_v35  ;;  %v2205_v35 = vld [vmem:[%s2568_s29 + $0x180] sm:$0xff] }
 0x147   : > { %v2160_v14 = vpop.eup %2159  ;;  %v707_v12 = vsub.f32 %v643_v37, %v675_v48  ;;  %v588_v51 = vpop.xlane.xlu1 %587  ;;  %v856_v23 = vmul.f32 %v2158_v46, %v2794_v61  ;;  %v855_v26 = vmul.f32 %v2158_v46, %v2790_v60  ;;  %v949_v24 = vsub.f32 %v2205_v35, %v2914_v5 }
 0x148   : > { %v740_v18 = vmax.f32 %v708_v11, 0.0  ;;  %v660_v27 = vmul.f32 0.00390625, %v588_v51  ;;  %v585_v50 = vpop.xlane.xlu0 %584  ;;  %v854_v54 = vmul.f32 %v2160_v14, %v2794_v61  ;;  %v853_v17 = vmul.f32 %v2160_v14, %v2790_v60 }
 0x149   : > { %v739_v20 = vmax.f32 %v707_v12, 0.0  ;;  %v659_v19 = vmul.f32 0.00390625, %v585_v50  ;;  %v984_v13 = vmul.f32 %v920_v36, %v856_v23  ;;  %v983_v10 = vmul.f32 %v919_v47, %v855_v26  ;;  %v2206_v23 = vld [vmem:[%s2568_s29 + $0xb0] sm:$0xff] }
 0x14a   : > { %v2162_v21 = vpop.eup %2161  ;;  %v772_v2 = vadd.f32 1e-05, %v740_v18  ;;  %v724_v22 = vsub.f32 %v660_v27, %v692_v25  ;;  %v982_v6 = vmul.f32 %v918_v7, %v854_v54  ;;  %v981_v28 = vmul.f32 %v917_v62, %v853_v17  ;;  %v2207_v18 = vld [vmem:[%s2568_s29 + $0xb8] sm:$0xff] }
 0x14b   : > { %v2164_v49 = vpop.eup %2163  ;;  %v771_v29 = vadd.f32 1e-05, %v739_v20  ;;  %v723_v32 = vsub.f32 %v659_v19, %v691_v15  ;;  %v386_v4 = vpop.xlane.xlu1 %385  ;;  %v888_v8 = vmul.f32 %v2162_v21, %v2794_v61  ;;  %v887_v39 = vmul.f32 %v2162_v21, %v2790_v60  ;;  %v2208_v20 = vld [vmem:[%s2568_s29 + $0xa0] sm:$0xff] }
 0x14c   : > { %2165 = vrsqrt.f32 %v772_v2  ;;  %v756_v0 = vmax.f32 %v724_v22, 0.0  ;;  %v383_v56 = vpop.xlane.xlu0 %382  ;;  %v1038_v30 = vpack.c.bf16 %v984_v13, %v982_v6  ;;  %v1037_v38 = vpack.c.bf16 %v983_v10, %v981_v28  ;;  %v2209_v13 = vld [vmem:[%s2568_s29 + $0xa8] sm:$0xff] }
 0x14d   : > { %2167 = vrsqrt.f32 %v771_v29  ;;  %v755_v63 = vmax.f32 %v723_v32, 0.0  ;;  %v886_v53 = vmul.f32 %v2164_v49, %v2794_v61  ;;  %v1016_v36 = vmul.f32 %v952_v55, %v888_v8 }
 0x14e   : > { %v788_v41 = vadd.f32 1e-05, %v756_v0  ;;  %1389 = vmatprep.mubr.bf16.mxu0 %v1038_v30  ;;  %v2987_v48 = vmul.f32 0.00390625, %v386_v4  ;;  %v885_v58 = vmul.f32 %v2164_v49, %v2790_v60  ;;  %v2990_v62 = vmul.f32 0.00390625, %v383_v56 }
 0x14f   : > { %v787_v31 = vadd.f32 1e-05, %v755_v63  ;;  %1390 = vmatmul.mubr.bf16.gmra.mrb[16].mxu0 %v1037_v38  ;;  %v434_v47 = vpop.xlane.xlu1 %433  ;;  %v1014_v46 = vmul.f32 %v950_v40, %v886_v53  ;;  %v1015_v52 = vmul.f32 %v951_v43, %v887_v39  ;;  %v923_v26 = vsub.f32 %v2206_v23, %v2947_v59 }
 0x150   : > { %2169 = vrsqrt.f32 %v788_v41  ;;  %v431_v37 = vpop.xlane.xlu0 %430  ;;  %v2992_v3 = vmul.f32 0.00390625, %v434_v47  ;;  %v1013_v7 = vmul.f32 %v949_v24, %v885_v58  ;;  %v678_v12 = vmul.f32 %v2987_v48, %v2987_v48  ;;  %v2210_v24 = vld [vmem:[%s2568_s29 + $0x1b8] sm:$0xff] }
 0x151   : > { %2171 = vrsqrt.f32 %v787_v31  ;;  %v1054_v5 = vpack.c.bf16 %v1016_v36, %v1014_v46  ;;  %v2994_v11 = vmul.f32 0.00390625, %v431_v37  ;;  %v924_v27 = vsub.f32 %v2207_v18, %v2947_v59 }
 0x152   : > { %v1053_v14 = vpack.c.bf16 %v1015_v52, %v1013_v7  ;;  %v677_v50 = vmul.f32 %v2990_v62, %v2990_v62  ;;  %v921_v19 = vsub.f32 %v2208_v20, %v2950_v57  ;;  %v922_v10 = vsub.f32 %v2209_v13, %v2950_v57 }
 0x153   : > { %v546_v25 = vpop.xlane.xlu1 %545  ;;  %1469 = vmatprep.mubr.bf16.mxu1 %v1054_v5  ;;  %v694_v2 = vmul.f32 %v2992_v3, %v2992_v3  ;;  %v693_v59 = vmul.f32 %v2994_v11, %v2994_v11  ;;  %v956_v31 = vsub.f32 %v2210_v24, %v2952_v16  ;;  %v2211_v5 = vld [vmem:[%s2568_s29 + $0x1a8] sm:$0xff] }
 0x154   : > { %v646_v51 = vmul.f32 0.00390625, %v546_v25  ;;  %v543_v15 = vpop.xlane.xlu0 %542  ;;  %1470 = vmatmul.mubr.bf16.gmra.mrb[16].mxu1 %v1053_v14  ;;  %v954_v7 = vsub.f32 %v2211_v5, %v2954_v34 }
 0x155   : > { %v645_v54 = vmul.f32 0.00390625, %v543_v15  ;;  %v2213_v15 = vld [vmem:[%s2568_s29 + $0x1a0] sm:$0xff] }
 0x156   : > { %v2166_v17 = vpop.eup %2165  ;;  %v710_v21 = vsub.f32 %v646_v51, %v678_v12  ;;  %v2212_v12 = vld [vmem:[%s2568_s29 + $0x1b0] sm:$0xff]  ;;  %v953_v23 = vsub.f32 %v2213_v15, %v2954_v34 }
 0x157   : > { %v2168_v22 = vpop.eup %2167  ;;  %v709_v6 = vsub.f32 %v645_v54, %v677_v50  ;;  %v594_v28 = vpop.xlane.xlu1 %593  ;;  %v860_v49 = vmul.f32 %v2166_v17, %v2794_v61  ;;  %v859_v29 = vmul.f32 %v2166_v17, %v2790_v60  ;;  %v955_v51 = vsub.f32 %v2212_v12, %v2952_v16 }
 0x158   : > { %v742_v32 = vmax.f32 %v710_v21, 0.0  ;;  %v662_v4 = vmul.f32 0.00390625, %v594_v28  ;;  %v591_v8 = vpop.xlane.xlu0 %590  ;;  %v858_v57 = vmul.f32 %v2168_v22, %v2794_v61  ;;  %v857_v1 = vmul.f32 %v2168_v22, %v2790_v60  ;;  %v2214_v21 = vld [vmem:[%s2568_s29 + $0xd0] sm:$0xff]  ;;  %v2215_v22 = vld [vmem:[%s2568_s29 + $0xd8] sm:$0xff] }
 0x159   : > { %v741_v55 = vmax.f32 %v709_v6, 0.0  ;;  %v661_v0 = vmul.f32 0.00390625, %v591_v8  ;;  %v988_v56 = vmul.f32 %v924_v27, %v860_v49  ;;  %v987_v30 = vmul.f32 %v923_v26, %v859_v29  ;;  %v2216_v49 = vld [vmem:[%s2568_s29 + $0xc0] sm:$0xff] }
 0x15a   : > { %v2170_v63 = vpop.eup %2169  ;;  %v774_v38 = vadd.f32 1e-05, %v742_v32  ;;  %v726_v39 = vsub.f32 %v662_v4, %v694_v2  ;;  %v986_v9 = vmul.f32 %v922_v10, %v858_v57  ;;  %v985_v40 = vmul.f32 %v921_v19, %v857_v1  ;;  %v2217_v1 = vld [vmem:[%s2568_s29 + $0xc8] sm:$0xff] }
 0x15b   : > { %v2172_v41 = vpop.eup %2171  ;;  %v773_v53 = vadd.f32 1e-05, %v741_v55  ;;  %v725_v42 = vsub.f32 %v661_v0, %v693_v59  ;;  %v392_v43 = vpop.xlane.xlu1 %391  ;;  %v892_v35 = vmul.f32 %v2170_v63, %v2794_v61  ;;  %v891_v52 = vmul.f32 %v2170_v63, %v2790_v60  ;;  %v2218_v0 = vld [vmem:[%s2568_s29 + $0x1d0] sm:$0xff] }
 0x15c   : > { %2173 = vrsqrt.f32 %v774_v38  ;;  %v758_v47 = vmax.f32 %v726_v39, 0.0  ;;  %v389_v36 = vpop.xlane.xlu0 %388  ;;  %v1040_v37 = vpack.c.bf16 %v988_v56, %v986_v9  ;;  %v1039_v58 = vpack.c.bf16 %v987_v30, %v985_v40  ;;  %v2219_v38 = vld [vmem:[%s2568_s29 + $0x1d8] sm:$0xff]  ;;  %v2220_v9 = vld [vmem:[%s2568_s29 + $0x1c8] sm:$0xff] }
 0x15d   : > { %2175 = vrsqrt.f32 %v773_v53  ;;  %v757_v46 = vmax.f32 %v725_v42, 0.0  ;;  %v890_v14 = vmul.f32 %v2172_v41, %v2794_v61  ;;  %v1020_v27 = vmul.f32 %v956_v31, %v892_v35 }
 0x15e   : > { %v790_v25 = vadd.f32 1e-05, %v758_v47  ;;  %1399 = vmatprep.mubr.bf16.mxu0 %v1040_v37  ;;  %v3027_v50 = vmul.f32 0.00390625, %v392_v43  ;;  %v889_v20 = vmul.f32 %v2172_v41, %v2790_v60  ;;  %v3030_v19 = vmul.f32 0.00390625, %v389_v36 }
 0x15f   : > { %v789_v26 = vadd.f32 1e-05, %v757_v46  ;;  %1400 = vmatmul.mubr.bf16.gmra.mrb[20].mxu0 %v1039_v58  ;;  %v440_v18 = vpop.xlane.xlu1 %439  ;;  %v1018_v17 = vmul.f32 %v954_v7, %v890_v14  ;;  %v1019_v16 = vmul.f32 %v955_v51, %v891_v52  ;;  %v927_v2 = vsub.f32 %v2214_v21, %v2987_v48 }
 0x160   : > { %2177 = vrsqrt.f32 %v790_v25  ;;  %v437_v54 = vpop.xlane.xlu0 %436  ;;  %v3032_v13 = vmul.f32 0.00390625, %v440_v18  ;;  %v1017_v10 = vmul.f32 %v953_v23, %v889_v20  ;;  %v928_v6 = vsub.f32 %v2215_v22, %v2987_v48 }
 0x161   : > { %2179 = vrsqrt.f32 %v789_v26  ;;  %v1056_v34 = vpack.c.bf16 %v1020_v27, %v1018_v17  ;;  %v3038_v28 = vmul.f32 0.00390625, %v437_v54  ;;  %v925_v29 = vsub.f32 %v2216_v49, %v2990_v62 }
 0x162   : > { %v1055_v32 = vpack.c.bf16 %v1019_v16, %v1017_v10  ;;  %v680_v4 = vmul.f32 %v3027_v50, %v3027_v50  ;;  %v926_v55 = vsub.f32 %v2217_v1, %v2990_v62  ;;  %v959_v48 = vsub.f32 %v2218_v0, %v2992_v3 }
 0x163   : > { %v552_v59 = vpop.xlane.xlu1 %551  ;;  %1479 = vmatprep.mubr.bf16.mxu1 %v1056_v34  ;;  %v679_v56 = vmul.f32 %v3030_v19, %v3030_v19  ;;  %v960_v39 = vsub.f32 %v2219_v38, %v2992_v3  ;;  %v958_v40 = vsub.f32 %v2220_v9, %v2994_v11  ;;  %v696_v53 = vmul.f32 %v3032_v13, %v3032_v13  ;;  %v2224_v38 = vld [vmem:[%s2568_s29 + $0xe0] sm:$0xff]  ;;  %v2225_v9 = vld [vmem:[%s2568_s29 + $0xe8] sm:$0xff] }
 0x164   : > { %v648_v8 = vmul.f32 0.00390625, %v552_v59  ;;  %v549_v57 = vpop.xlane.xlu0 %548  ;;  %1480 = vmatmul.mubr.bf16.gmra.mrb[20].mxu1 %v1055_v32  ;;  %v695_v35 = vmul.f32 %v3038_v28, %v3038_v28 }
 0x165   : > { %v647_v30 = vmul.f32 0.00390625, %v549_v57 }
 0x166   : > { %v2174_v63 = vpop.eup %2173  ;;  %v712_v41 = vsub.f32 %v648_v8, %v680_v4 }
 0x167   : > { %v2176_v62 = vpop.eup %2175  ;;  %v711_v42 = vsub.f32 %v647_v30, %v679_v56  ;;  %v600_v43 = vpop.xlane.xlu1 %599  ;;  %v864_v24 = vmul.f32 %v2174_v63, %v2794_v61  ;;  %v863_v31 = vmul.f32 %v2174_v63, %v2790_v60 }
 0x168   : > { %v744_v47 = vmax.f32 %v712_v41, 0.0  ;;  %v664_v3 = vmul.f32 0.00390625, %v600_v43  ;;  %v597_v36 = vpop.xlane.xlu0 %596  ;;  %v862_v37 = vmul.f32 %v2176_v62, %v2794_v61  ;;  %v861_v46 = vmul.f32 %v2176_v62, %v2790_v60 }
 0x169   : > { %v743_v58 = vmax.f32 %v711_v42, 0.0  ;;  %v663_v52 = vmul.f32 0.00390625, %v597_v36  ;;  %v992_v5 = vmul.f32 %v928_v6, %v864_v24  ;;  %v991_v7 = vmul.f32 %v927_v2, %v863_v31  ;;  %v2221_v2 = vld [vmem:[%s2568_s29 + $0x1c0] sm:$0xff]  ;;  %v2227_v24 = vld [vmem:[%s2568_s29 + $0x1f8] sm:$0xff] }
 0x16a   : > { %v2178_v25 = vpop.eup %2177  ;;  %v776_v14 = vadd.f32 1e-05, %v744_v47  ;;  %v728_v12 = vsub.f32 %v664_v3, %v696_v53  ;;  %v990_v51 = vmul.f32 %v926_v55, %v862_v37  ;;  %v989_v15 = vmul.f32 %v925_v29, %v861_v46  ;;  %v2222_v55 = vld [vmem:[%s2568_s29 + $0xf0] sm:$0xff]  ;;  %v2228_v37 = vld [vmem:[%s2568_s29 + $0x1e0] sm:$0xff] }
 0x16b   : > { %v2180_v23 = vpop.eup %2179  ;;  %v775_v26 = vadd.f32 1e-05, %v743_v58  ;;  %v727_v18 = vsub.f32 %v663_v52, %v695_v35  ;;  %v896_v27 = vmul.f32 %v2178_v25, %v2794_v61  ;;  %v895_v54 = vmul.f32 %v2178_v25, %v2790_v60 }
 0x16c   : > { %2181 = vrsqrt.f32 %v776_v14  ;;  %v760_v17 = vmax.f32 %v728_v12, 0.0  ;;  %v1042_v20 = vpack.c.bf16 %v992_v5, %v990_v51  ;;  %v1041_v16 = vpack.c.bf16 %v991_v7, %v989_v15 }
 0x16d   : > { %2183 = vrsqrt.f32 %v775_v26  ;;  %v759_v34 = vmax.f32 %v727_v18, 0.0  ;;  %v894_v10 = vmul.f32 %v2180_v23, %v2794_v61  ;;  %v1024_v21 = vmul.f32 %v960_v39, %v896_v27  ;;  %v1643_v18 = vld [vmem:[%s3357_s2] sm:$0x3] }
 0x16e   : > { %v957_v22 = vsub.f32 %v2221_v2, %v2994_v11  ;;  %v792_v6 = vadd.f32 1e-05, %v760_v17  ;;  %1409 = vmatprep.mubr.bf16.mxu0 %v1042_v20  ;;  %v893_v59 = vmul.f32 %v2180_v23, %v2790_v60  ;;  %v1023_v49 = vmul.f32 %v959_v48, %v895_v54  ;;  %v2223_v48 = vld [vmem:[%s2568_s29 + $0xf8] sm:$0xff]  ;;  %v1515_v27 = vld [vmem:[%s2568_s29] sm:$0xff]  ;;  %v1517_v20 = vld [vmem:[%s2568_s29 + $0x10] sm:$0xff] }
 0x16f   : > { %v791_v29 = vadd.f32 1e-05, %v759_v34  ;;  %1410 = vmatmul.mubr.bf16.gmra.mrb[24].mxu0 %v1041_v16  ;;  %v1022_v32 = vmul.f32 %v958_v40, %v894_v10  ;;  %v931_v0 = vsub.f32 %v2222_v55, %v3027_v50  ;;  %v932_v56 = vsub.f32 %v2223_v48, %v3027_v50  ;;  %v2226_v50 = vld [vmem:[%s2568_s29 + $0x1f0] sm:$0xff]  ;;  %v1518_v10 = vld [vmem:[%s2568_s29 + $0x18] sm:$0xff] }
 0x170   : > { %2185 = vrsqrt.f32 %v792_v6  ;;  %v1021_v4 = vmul.f32 %v957_v22, %v893_v59  ;;  %v929_v39 = vsub.f32 %v2224_v38, %v3030_v19  ;;  %v930_v40 = vsub.f32 %v2225_v9, %v3030_v19  ;;  %v2229_v19 = vld [vmem:[%s2568_s29 + $0x1e8] sm:$0xff] }
 0x171   : > { %2187 = vrsqrt.f32 %v791_v29  ;;  %v1058_v8 = vpack.c.bf16 %v1024_v21, %v1022_v32  ;;  %v963_v35 = vsub.f32 %v2226_v50, %v3032_v13  ;;  %v964_v31 = vsub.f32 %v2227_v24, %v3032_v13  ;;  %v1548_v32 = vld [vmem:[%s2568_s29 + $0x108] sm:$0xff]  ;;  %v1522_v50 = vld [vmem:[%s2568_s29 + $0x38] sm:$0xff] }
 0x172   : > { %v1057_v57 = vpack.c.bf16 %v1023_v49, %v1021_v4  ;;  %v961_v46 = vsub.f32 %v2228_v37, %v3038_v28  ;;  %v962_v58 = vsub.f32 %v2229_v19, %v3038_v28  ;;  %v3103_v17 = vrot.slane %v1643_v18, %v833_v45  ;;  %v1547_v45 = vld [vmem:[%s2568_s29 + $0x100] sm:$0xff] }
 0x173   : > { %1489 = vmatprep.mubr.bf16.mxu1 %v1058_v8  ;;  %v1549_v8 = vld [vmem:[%s2568_s29 + $0x110] sm:$0xff]  ;;  %v1551_v19 = vld [vmem:[%s2568_s29 + $0x120] sm:$0xff] }
 0x174   : > { %1490 = vmatmul.mubr.bf16.gmra.mrb[24].mxu1 %v1057_v57 }
 0x176   : > { %v2182_v11 = vpop.eup %2181 }
 0x177   : > { %v2184_v1 = vpop.eup %2183  ;;  %v868_v30 = vmul.f32 %v2182_v11, %v2794_v61  ;;  %v867_v63 = vmul.f32 %v2182_v11, %v2790_v60 }
 0x178   : > { %v866_v41 = vmul.f32 %v2184_v1, %v2794_v61  ;;  %v865_v53 = vmul.f32 %v2184_v1, %v2790_v60  ;;  %v1550_v1 = vld [vmem:[%s2568_s29 + $0x118] sm:$0xff] }
 0x179   : > { %v996_v62 = vmul.f32 %v932_v56, %v868_v30  ;;  %v995_v42 = vmul.f32 %v931_v0, %v867_v63 }
 0x17a   : > { %v2186_v43 = vpop.eup %2185  ;;  %v994_v47 = vmul.f32 %v930_v40, %v866_v41  ;;  %v993_v3 = vmul.f32 %v929_v39, %v865_v53  ;;  %v1519_v40 = vld [vmem:[%s2568_s29 + $0x20] sm:$0xff]  ;;  %v1520_v41 = vld [vmem:[%s2568_s29 + $0x28] sm:$0xff] }
 0x17b   : > { %v2188_v36 = vpop.eup %2187  ;;  %v900_v52 = vmul.f32 %v2186_v43, %v2794_v61  ;;  %v899_v5 = vmul.f32 %v2186_v43, %v2790_v60 }
 0x17c   : > { %v1044_v7 = vpack.c.bf16 %v996_v62, %v994_v47  ;;  %v1043_v25 = vpack.c.bf16 %v995_v42, %v993_v3  ;;  %v898_v14 = vmul.f32 %v2188_v36, %v2794_v61  ;;  %v897_v13 = vmul.f32 %v2188_v36, %v2790_v60  ;;  %v1516_v61 = vld [vmem:[%s2568_s29 + $0x8] sm:$0xff]  ;;  %v1521_v62 = vld [vmem:[%s2568_s29 + $0x30] sm:$0xff] }
 0x17d   : > { %v1028_v12 = vmul.f32 %v964_v31, %v900_v52  ;;  %v1027_v51 = vmul.f32 %v963_v35, %v899_v5  ;;  %v3098_v60 = vrot.slane %v1643_v18, %v829_v44  ;;  %v1552_v52 = vld [vmem:[%s2568_s29 + $0x128] sm:$0xff] }
 0x17e   : > { %1419 = vmatprep.mubr.bf16.mxu0 %v1044_v7  ;;  %v1026_v15 = vmul.f32 %v962_v58, %v898_v14  ;;  %v1025_v23 = vmul.f32 %v961_v46, %v897_v13  ;;  %v1553_v7 = vld [vmem:[%s2568_s29 + $0x130] sm:$0xff]  ;;  %v1554_v13 = vld [vmem:[%s2568_s29 + $0x138] sm:$0xff] }
 0x17f   : > { %1420 = vmatmul.mubr.bf16.gmra.mrb[28].mxu0 %v1043_v25 }
 0x180   : > { %v1060_v28 = vpack.c.bf16 %v1028_v12, %v1026_v15  ;;  %v1059_v26 = vpack.c.bf16 %v1027_v51, %v1025_v23 }
 0x182   : > { %1499 = vmatprep.mubr.bf16.mxu1 %v1060_v28 }
 0x183   : > { %1500 = vmatmul.mubr.bf16.gmra.mrb[28].mxu1 %v1059_v26 }
 0x1e2   : > { %v1351_v54 = vpop.f32.mrb[0].mxu0 }
 0x1e3   : > { %v1579_v16 = vadd.f32 %v1515_v27, %v1351_v54  ;;  %v1353_v34 = vpop.f32.mrb[1].mxu0  ;;  %v1523_v54 = vld [vmem:[%s2568_s29 + $0x40] sm:$0xff] }
 0x1e4   : > { %v1580_v21 = vadd.f32 %v1516_v61, %v1353_v34  ;;  %v1355_v2 = vpop.f32.mrb[2].mxu0  ;;  %v1525_v34 = vld [vmem:[%s2568_s29 + $0x50] sm:$0xff] }
 0x1e5   : > { %v1655_v22 = vadd.f32 %v3098_v60, %v1579_v16  ;;  %v1581_v6 = vadd.f32 %v1517_v20, %v1355_v2  ;;  %v1357_v44 = vpop.f32.mrb[3].mxu0  ;;  %v1524_v20 = vld [vmem:[%s2568_s29 + $0x48] sm:$0xff]  ;;  %v1526_v2 = vld [vmem:[%s2568_s29 + $0x58] sm:$0xff] }
 0x1e6   : > { %v1656_v59 = vadd.f32 %v3103_v17, %v1580_v21  ;;  %v1582_v49 = vadd.f32 %v1518_v10, %v1357_v44 }
 0x1e7   : > { %1719 = vst [vmem:[%s3111_s21] sm:$0xff] %v1655_v22  ;;  %v1657_v33 = vadd.f32 %v3098_v60, %v1581_v6 }
 0x1e8   : > { %1720 = vst [vmem:[%s3111_s21 + $0x8] sm:$0xff] %v1656_v59  ;;  %v1658_v29 = vadd.f32 %v3103_v17, %v1582_v49  ;;  %v1431_v4 = vpop.f32.mrb[0].mxu1 }
 0x1e9   : > { %1721 = vst [vmem:[%s3111_s21 + $0x10] sm:$0xff] %v1657_v33  ;;  %v1611_v57 = vadd.f32 %v1547_v45, %v1431_v4  ;;  %v1433_v11 = vpop.f32.mrb[1].mxu1 }
 0x1ea   : > { %1722 = vst [vmem:[%s3111_s21 + $0x18] sm:$0xff] %v1658_v29  ;;  %v1612_v55 = vadd.f32 %v1548_v32, %v1433_v11  ;;  %v1435_v0 = vpop.f32.mrb[2].mxu1  ;;  %v1555_v32 = vld [vmem:[%s2568_s29 + $0x140] sm:$0xff]  ;;  %v1557_v11 = vld [vmem:[%s2568_s29 + $0x150] sm:$0xff] }
 0x1eb   : > { %v1687_v48 = vadd.f32 %v3098_v60, %v1611_v57  ;;  %v1613_v56 = vadd.f32 %v1549_v8, %v1435_v0  ;;  %v1437_v30 = vpop.f32.mrb[3].mxu1  ;;  %v1556_v8 = vld [vmem:[%s2568_s29 + $0x148] sm:$0xff]  ;;  %v1558_v0 = vld [vmem:[%s2568_s29 + $0x158] sm:$0xff] }
 0x1ec   : > { %v1688_v63 = vadd.f32 %v3103_v17, %v1612_v55  ;;  %v1614_v38 = vadd.f32 %v1550_v1, %v1437_v30 }
 0x1ed   : > { %1751 = vst [vmem:[%s3111_s21 + $0x100] sm:$0xff] %v1687_v48  ;;  %v1689_v39 = vadd.f32 %v3098_v60, %v1613_v56 }
 0x1ee   : > { %1752 = vst [vmem:[%s3111_s21 + $0x108] sm:$0xff] %v1688_v63  ;;  %v1690_v9 = vadd.f32 %v3103_v17, %v1614_v38 }
 0x1ef   : > { %1753 = vst [vmem:[%s3111_s21 + $0x110] sm:$0xff] %v1689_v39 }
 0x1f0   : > { %1754 = vst [vmem:[%s3111_s21 + $0x118] sm:$0xff] %v1690_v9 }
 0x1f2   : > { %v1361_v53 = vpop.f32.mrb[4].mxu0 }
 0x1f3   : > { %v1583_v42 = vadd.f32 %v1519_v40, %v1361_v53  ;;  %v1363_v43 = vpop.f32.mrb[5].mxu0  ;;  %v1527_v53 = vld [vmem:[%s2568_s29 + $0x60] sm:$0xff] }
 0x1f4   : > { %v1584_v35 = vadd.f32 %v1520_v41, %v1363_v43  ;;  %v1365_v24 = vpop.f32.mrb[6].mxu0  ;;  %v1529_v43 = vld [vmem:[%s2568_s29 + $0x70] sm:$0xff] }
 0x1f5   : > { %v1659_v31 = vadd.f32 %v3098_v60, %v1583_v42  ;;  %v1585_v47 = vadd.f32 %v1521_v62, %v1365_v24  ;;  %v1367_v3 = vpop.f32.mrb[7].mxu0  ;;  %v1528_v62 = vld [vmem:[%s2568_s29 + $0x68] sm:$0xff]  ;;  %v1530_v24 = vld [vmem:[%s2568_s29 + $0x78] sm:$0xff] }
 0x1f6   : > { %v1660_v36 = vadd.f32 %v3103_v17, %v1584_v35  ;;  %v1586_v37 = vadd.f32 %v1522_v50, %v1367_v3 }
 0x1f7   : > { %1723 = vst [vmem:[%s3111_s21 + $0x20] sm:$0xff] %v1659_v31  ;;  %v1661_v46 = vadd.f32 %v3098_v60, %v1585_v47 }
 0x1f8   : > { %1724 = vst [vmem:[%s3111_s21 + $0x28] sm:$0xff] %v1660_v36  ;;  %v1662_v58 = vadd.f32 %v3103_v17, %v1586_v37  ;;  %v1441_v5 = vpop.f32.mrb[4].mxu1 }
 0x1f9   : > { %1725 = vst [vmem:[%s3111_s21 + $0x30] sm:$0xff] %v1661_v46  ;;  %v1615_v25 = vadd.f32 %v1551_v19, %v1441_v5  ;;  %v1443_v14 = vpop.f32.mrb[5].mxu1 }
 0x1fa   : > { %1726 = vst [vmem:[%s3111_s21 + $0x38] sm:$0xff] %v1662_v58  ;;  %v1616_v12 = vadd.f32 %v1552_v52, %v1443_v14  ;;  %v1445_v51 = vpop.f32.mrb[6].mxu1  ;;  %v1559_v52 = vld [vmem:[%s2568_s29 + $0x160] sm:$0xff]  ;;  %v1561_v14 = vld [vmem:[%s2568_s29 + $0x170] sm:$0xff] }
 0x1fb   : > { %v1691_v15 = vadd.f32 %v3098_v60, %v1615_v25  ;;  %v1617_v23 = vadd.f32 %v1553_v7, %v1445_v51  ;;  %v1447_v28 = vpop.f32.mrb[7].mxu1  ;;  %v1560_v7 = vld [vmem:[%s2568_s29 + $0x168] sm:$0xff]  ;;  %v1562_v51 = vld [vmem:[%s2568_s29 + $0x178] sm:$0xff] }
 0x1fc   : > { %v1692_v26 = vadd.f32 %v3103_v17, %v1616_v12  ;;  %v1618_v18 = vadd.f32 %v1554_v13, %v1447_v28 }
 0x1fd   : > { %1755 = vst [vmem:[%s3111_s21 + $0x120] sm:$0xff] %v1691_v15  ;;  %v1693_v27 = vadd.f32 %v3098_v60, %v1617_v23 }
 0x1fe   : > { %1756 = vst [vmem:[%s3111_s21 + $0x128] sm:$0xff] %v1692_v26  ;;  %v1694_v61 = vadd.f32 %v3103_v17, %v1618_v18 }
 0x1ff   : > { %1757 = vst [vmem:[%s3111_s21 + $0x130] sm:$0xff] %v1693_v27 }
 0x200   : > { %1758 = vst [vmem:[%s3111_s21 + $0x138] sm:$0xff] %v1694_v61 }
 0x202   : > { %v1371_v16 = vpop.f32.mrb[8].mxu0 }
 0x203   : > { %v1587_v10 = vadd.f32 %v1523_v54, %v1371_v16  ;;  %v1373_v21 = vpop.f32.mrb[9].mxu0  ;;  %v1531_v16 = vld [vmem:[%s2568_s29 + $0x80] sm:$0xff] }
 0x204   : > { %v1588_v22 = vadd.f32 %v1524_v20, %v1373_v21  ;;  %v1375_v6 = vpop.f32.mrb[10].mxu0  ;;  %v1533_v21 = vld [vmem:[%s2568_s29 + $0x90] sm:$0xff] }
 0x205   : > { %v1663_v44 = vadd.f32 %v3098_v60, %v1587_v10  ;;  %v1589_v59 = vadd.f32 %v1525_v34, %v1375_v6  ;;  %v1377_v49 = vpop.f32.mrb[11].mxu0  ;;  %v1532_v34 = vld [vmem:[%s2568_s29 + $0x88] sm:$0xff]  ;;  %v1534_v6 = vld [vmem:[%s2568_s29 + $0x98] sm:$0xff] }
 0x206   : > { %v1664_v33 = vadd.f32 %v3103_v17, %v1588_v22  ;;  %v1590_v45 = vadd.f32 %v1526_v2, %v1377_v49 }
 0x207   : > { %1727 = vst [vmem:[%s3111_s21 + $0x40] sm:$0xff] %v1663_v44  ;;  %v1665_v29 = vadd.f32 %v3098_v60, %v1589_v59 }
 0x208   : > { %1728 = vst [vmem:[%s3111_s21 + $0x48] sm:$0xff] %v1664_v33  ;;  %v1666_v4 = vadd.f32 %v3103_v17, %v1590_v45  ;;  %v1451_v57 = vpop.f32.mrb[8].mxu1 }
 0x209   : > { %1729 = vst [vmem:[%s3111_s21 + $0x50] sm:$0xff] %v1665_v29  ;;  %v1619_v1 = vadd.f32 %v1555_v32, %v1451_v57  ;;  %v1453_v55 = vpop.f32.mrb[9].mxu1 }
 0x20a   : > { %1730 = vst [vmem:[%s3111_s21 + $0x58] sm:$0xff] %v1666_v4  ;;  %v1620_v48 = vadd.f32 %v1556_v8, %v1453_v55  ;;  %v1455_v56 = vpop.f32.mrb[10].mxu1  ;;  %v1563_v8 = vld [vmem:[%s2568_s29 + $0x180] sm:$0xff]  ;;  %v1565_v55 = vld [vmem:[%s2568_s29 + $0x190] sm:$0xff] }
 0x20b   : > { %v1695_v30 = vadd.f32 %v3098_v60, %v1619_v1  ;;  %v1621_v63 = vadd.f32 %v1557_v11, %v1455_v56  ;;  %v1457_v38 = vpop.f32.mrb[11].mxu1  ;;  %v1564_v11 = vld [vmem:[%s2568_s29 + $0x188] sm:$0xff]  ;;  %v1566_v56 = vld [vmem:[%s2568_s29 + $0x198] sm:$0xff] }
 0x20c   : > { %v1696_v39 = vadd.f32 %v3103_v17, %v1620_v48  ;;  %v1622_v9 = vadd.f32 %v1558_v0, %v1457_v38 }
 0x20d   : > { %1759 = vst [vmem:[%s3111_s21 + $0x140] sm:$0xff] %v1695_v30  ;;  %v1697_v40 = vadd.f32 %v3098_v60, %v1621_v63 }
 0x20e   : > { %1760 = vst [vmem:[%s3111_s21 + $0x148] sm:$0xff] %v1696_v39  ;;  %v1698_v41 = vadd.f32 %v3103_v17, %v1622_v9 }
 0x20f   : > { %1761 = vst [vmem:[%s3111_s21 + $0x150] sm:$0xff] %v1697_v40 }
 0x210   : > { %1762 = vst [vmem:[%s3111_s21 + $0x158] sm:$0xff] %v1698_v41 }
 0x212   : > { %v1381_v42 = vpop.f32.mrb[12].mxu0 }
 0x213   : > { %v1591_v50 = vadd.f32 %v1527_v53, %v1381_v42  ;;  %v1383_v35 = vpop.f32.mrb[13].mxu0  ;;  %v1535_v42 = vld [vmem:[%s2568_s29 + $0xa0] sm:$0xff] }
 0x214   : > { %v1592_v31 = vadd.f32 %v1528_v62, %v1383_v35  ;;  %v1385_v47 = vpop.f32.mrb[14].mxu0  ;;  %v1537_v35 = vld [vmem:[%s2568_s29 + $0xb0] sm:$0xff] }
 0x215   : > { %v1667_v3 = vadd.f32 %v3098_v60, %v1591_v50  ;;  %v1593_v36 = vadd.f32 %v1529_v43, %v1385_v47  ;;  %v1387_v37 = vpop.f32.mrb[15].mxu0  ;;  %v1536_v43 = vld [vmem:[%s2568_s29 + $0xa8] sm:$0xff]  ;;  %v1538_v47 = vld [vmem:[%s2568_s29 + $0xb8] sm:$0xff] }
 0x216   : > { %v1668_v46 = vadd.f32 %v3103_v17, %v1592_v31  ;;  %v1594_v19 = vadd.f32 %v1530_v24, %v1387_v37 }
 0x217   : > { %1731 = vst [vmem:[%s3111_s21 + $0x60] sm:$0xff] %v1667_v3  ;;  %v1669_v58 = vadd.f32 %v3098_v60, %v1593_v36  ;;  %v1461_v25 = vpop.f32.mrb[12].mxu1 }
 0x218   : > { %1732 = vst [vmem:[%s3111_s21 + $0x68] sm:$0xff] %v1668_v46  ;;  %v1670_v5 = vadd.f32 %v3103_v17, %v1594_v19  ;;  %v1623_v13 = vadd.f32 %v1559_v52, %v1461_v25  ;;  %v1463_v12 = vpop.f32.mrb[13].mxu1 }
 0x219   : > { %1733 = vst [vmem:[%s3111_s21 + $0x70] sm:$0xff] %v1669_v58  ;;  %v1624_v15 = vadd.f32 %v1560_v7, %v1463_v12  ;;  %v1465_v23 = vpop.f32.mrb[14].mxu1  ;;  %v1567_v7 = vld [vmem:[%s2568_s29 + $0x1a0] sm:$0xff]  ;;  %v1569_v12 = vld [vmem:[%s2568_s29 + $0x1b0] sm:$0xff] }
 0x21a   : > { %1734 = vst [vmem:[%s3111_s21 + $0x78] sm:$0xff] %v1670_v5  ;;  %v1699_v28 = vadd.f32 %v3098_v60, %v1623_v13  ;;  %v1625_v26 = vadd.f32 %v1561_v14, %v1465_v23  ;;  %v1467_v18 = vpop.f32.mrb[15].mxu1  ;;  %v1568_v14 = vld [vmem:[%s2568_s29 + $0x1a8] sm:$0xff]  ;;  %v1570_v23 = vld [vmem:[%s2568_s29 + $0x1b8] sm:$0xff] }
 0x21b   : > { %v1700_v27 = vadd.f32 %v3103_v17, %v1624_v15  ;;  %v1626_v61 = vadd.f32 %v1562_v51, %v1467_v18 }
 0x21c   : > { %1763 = vst [vmem:[%s3111_s21 + $0x160] sm:$0xff] %v1699_v28  ;;  %v1701_v54 = vadd.f32 %v3098_v60, %v1625_v26 }
 0x21d   : > { %1764 = vst [vmem:[%s3111_s21 + $0x168] sm:$0xff] %v1700_v27  ;;  %v1702_v20 = vadd.f32 %v3103_v17, %v1626_v61 }
 0x21e   : > { %1765 = vst [vmem:[%s3111_s21 + $0x170] sm:$0xff] %v1701_v54 }
 0x21f   : > { %1766 = vst [vmem:[%s3111_s21 + $0x178] sm:$0xff] %v1702_v20 }
 0x222   : > { %v1391_v10 = vpop.f32.mrb[16].mxu0 }
 0x223   : > { %v1595_v2 = vadd.f32 %v1531_v16, %v1391_v10  ;;  %v1393_v22 = vpop.f32.mrb[17].mxu0  ;;  %v1539_v10 = vld [vmem:[%s2568_s29 + $0xc0] sm:$0xff] }
 0x224   : > { %v1596_v44 = vadd.f32 %v1532_v34, %v1393_v22  ;;  %v1395_v59 = vpop.f32.mrb[18].mxu0  ;;  %v1541_v22 = vld [vmem:[%s2568_s29 + $0xd0] sm:$0xff] }
 0x225   : > { %v1671_v49 = vadd.f32 %v3098_v60, %v1595_v2  ;;  %v1597_v33 = vadd.f32 %v1533_v21, %v1395_v59  ;;  %v1397_v45 = vpop.f32.mrb[19].mxu0  ;;  %v1540_v21 = vld [vmem:[%s2568_s29 + $0xc8] sm:$0xff]  ;;  %v1542_v59 = vld [vmem:[%s2568_s29 + $0xd8] sm:$0xff] }
 0x226   : > { %v1672_v29 = vadd.f32 %v3103_v17, %v1596_v44  ;;  %v1598_v32 = vadd.f32 %v1534_v6, %v1397_v45 }
 0x227   : > { %1735 = vst [vmem:[%s3111_s21 + $0x80] sm:$0xff] %v1671_v49  ;;  %v1673_v4 = vadd.f32 %v3098_v60, %v1597_v33  ;;  %v1471_v1 = vpop.f32.mrb[16].mxu1 }
 0x228   : > { %1736 = vst [vmem:[%s3111_s21 + $0x88] sm:$0xff] %v1672_v29  ;;  %v1674_v57 = vadd.f32 %v3103_v17, %v1598_v32  ;;  %v1627_v0 = vadd.f32 %v1563_v8, %v1471_v1  ;;  %v1473_v48 = vpop.f32.mrb[17].mxu1 }
 0x229   : > { %1737 = vst [vmem:[%s3111_s21 + $0x90] sm:$0xff] %v1673_v4  ;;  %v1628_v30 = vadd.f32 %v1564_v11, %v1473_v48  ;;  %v1475_v63 = vpop.f32.mrb[18].mxu1  ;;  %v1571_v4 = vld [vmem:[%s2568_s29 + $0x1c0] sm:$0xff]  ;;  %v1572_v11 = vld [vmem:[%s2568_s29 + $0x1c8] sm:$0xff] }
 0x22a   : > { %1738 = vst [vmem:[%s3111_s21 + $0x98] sm:$0xff] %v1674_v57  ;;  %v1703_v38 = vadd.f32 %v3098_v60, %v1627_v0  ;;  %v1629_v39 = vadd.f32 %v1565_v55, %v1475_v63  ;;  %v1477_v9 = vpop.f32.mrb[19].mxu1  ;;  %v1573_v0 = vld [vmem:[%s2568_s29 + $0x1d0] sm:$0xff]  ;;  %v1574_v63 = vld [vmem:[%s2568_s29 + $0x1d8] sm:$0xff] }
 0x22b   : > { %v1704_v40 = vadd.f32 %v3103_v17, %v1628_v30  ;;  %v1630_v41 = vadd.f32 %v1566_v56, %v1477_v9 }
 0x22c   : > { %1767 = vst [vmem:[%s3111_s21 + $0x180] sm:$0xff] %v1703_v38  ;;  %v1705_v53 = vadd.f32 %v3098_v60, %v1629_v39 }
 0x22d   : > { %1768 = vst [vmem:[%s3111_s21 + $0x188] sm:$0xff] %v1704_v40  ;;  %v1706_v62 = vadd.f32 %v3103_v17, %v1630_v41 }
 0x22e   : > { %1769 = vst [vmem:[%s3111_s21 + $0x190] sm:$0xff] %v1705_v53 }
 0x22f   : > { %1770 = vst [vmem:[%s3111_s21 + $0x198] sm:$0xff] %v1706_v62 }
 0x232   : > { %v1401_v50 = vpop.f32.mrb[20].mxu0 }
 0x233   : > { %v1599_v24 = vadd.f32 %v1535_v42, %v1401_v50  ;;  %v1403_v31 = vpop.f32.mrb[21].mxu0  ;;  %v1543_v50 = vld [vmem:[%s2568_s29 + $0xe0] sm:$0xff] }
 0x234   : > { %v1600_v3 = vadd.f32 %v1536_v43, %v1403_v31  ;;  %v1405_v36 = vpop.f32.mrb[22].mxu0  ;;  %v1545_v31 = vld [vmem:[%s2568_s29 + $0xf0] sm:$0xff] }
 0x235   : > { %v1675_v37 = vadd.f32 %v3098_v60, %v1599_v24  ;;  %v1601_v46 = vadd.f32 %v1537_v35, %v1405_v36  ;;  %v1407_v19 = vpop.f32.mrb[23].mxu0  ;;  %v1544_v35 = vld [vmem:[%s2568_s29 + $0xe8] sm:$0xff]  ;;  %v1546_v36 = vld [vmem:[%s2568_s29 + $0xf8] sm:$0xff] }
 0x236   : > { %v1676_v58 = vadd.f32 %v3103_v17, %v1600_v3  ;;  %v1602_v52 = vadd.f32 %v1538_v47, %v1407_v19  ;;  %v1575_v19 = vld [vmem:[%s2568_s29 + $0x1e0] sm:$0xff] }
 0x237   : > { %1739 = vst [vmem:[%s3111_s21 + $0xa0] sm:$0xff] %v1675_v37  ;;  %v1677_v5 = vadd.f32 %v3098_v60, %v1601_v46  ;;  %v1481_v13 = vpop.f32.mrb[20].mxu1 }
 0x238   : > { %1740 = vst [vmem:[%s3111_s21 + $0xa8] sm:$0xff] %v1676_v58  ;;  %v1678_v25 = vadd.f32 %v3103_v17, %v1602_v52  ;;  %v1631_v51 = vadd.f32 %v1567_v7, %v1481_v13  ;;  %v1483_v15 = vpop.f32.mrb[21].mxu1  ;;  %v1576_v7 = vld [vmem:[%s2568_s29 + $0x1e8] sm:$0xff] }
 0x239   : > { %1741 = vst [vmem:[%s3111_s21 + $0xb0] sm:$0xff] %v1677_v5  ;;  %v1632_v28 = vadd.f32 %v1568_v14, %v1483_v15  ;;  %v1485_v26 = vpop.f32.mrb[22].mxu1 }
 0x23a   : > { %1742 = vst [vmem:[%s3111_s21 + $0xb8] sm:$0xff] %v1678_v25  ;;  %v1707_v18 = vadd.f32 %v3098_v60, %v1631_v51  ;;  %v1633_v27 = vadd.f32 %v1569_v12, %v1485_v26  ;;  %v1487_v61 = vpop.f32.mrb[23].mxu1  ;;  %v1577_v12 = vld [vmem:[%s2568_s29 + $0x1f0] sm:$0xff] }
 0x23b   : > { %v1708_v54 = vadd.f32 %v3103_v17, %v1632_v28  ;;  %v1634_v20 = vadd.f32 %v1570_v23, %v1487_v61  ;;  %v1578_v28 = vld [vmem:[%s2568_s29 + $0x1f8] sm:$0xff] }
 0x23c   : > { %1771 = vst [vmem:[%s3111_s21 + $0x1a0] sm:$0xff] %v1707_v18  ;;  %v1709_v16 = vadd.f32 %v3098_v60, %v1633_v27 }
 0x23d   : > { %1772 = vst [vmem:[%s3111_s21 + $0x1a8] sm:$0xff] %v1708_v54  ;;  %v1710_v34 = vadd.f32 %v3103_v17, %v1634_v20 }
 0x23e   : > { %1773 = vst [vmem:[%s3111_s21 + $0x1b0] sm:$0xff] %v1709_v16 }
 0x23f   : > { %1774 = vst [vmem:[%s3111_s21 + $0x1b8] sm:$0xff] %v1710_v34 }
 0x242   : > { %v1411_v2 = vpop.f32.mrb[24].mxu0 }
 0x243   : > { %v1603_v6 = vadd.f32 %v1539_v10, %v1411_v2  ;;  %v1413_v44 = vpop.f32.mrb[25].mxu0 }
 0x244   : > { %v1604_v49 = vadd.f32 %v1540_v21, %v1413_v44  ;;  %v1415_v33 = vpop.f32.mrb[26].mxu0 }
 0x245   : > { %v1679_v45 = vadd.f32 %v3098_v60, %v1603_v6  ;;  %v1605_v29 = vadd.f32 %v1541_v22, %v1415_v33  ;;  %v1417_v32 = vpop.f32.mrb[27].mxu0 }
 0x246   : > { %v1680_v8 = vadd.f32 %v3103_v17, %v1604_v49  ;;  %v1606_v57 = vadd.f32 %v1542_v59, %v1417_v32 }
 0x247   : > { %1743 = vst [vmem:[%s3111_s21 + $0xc0] sm:$0xff] %v1679_v45  ;;  %v1681_v1 = vadd.f32 %v3098_v60, %v1605_v29  ;;  %v1491_v55 = vpop.f32.mrb[24].mxu1 }
 0x248   : > { %1744 = vst [vmem:[%s3111_s21 + $0xc8] sm:$0xff] %v1680_v8  ;;  %v1682_v48 = vadd.f32 %v3103_v17, %v1606_v57  ;;  %v1635_v56 = vadd.f32 %v1571_v4, %v1491_v55  ;;  %v1493_v30 = vpop.f32.mrb[25].mxu1 }
 0x249   : > { %1745 = vst [vmem:[%s3111_s21 + $0xd0] sm:$0xff] %v1681_v1  ;;  %v1636_v38 = vadd.f32 %v1572_v11, %v1493_v30  ;;  %v1495_v39 = vpop.f32.mrb[26].mxu1 }
 0x24a   : > { %1746 = vst [vmem:[%s3111_s21 + $0xd8] sm:$0xff] %v1682_v48  ;;  %v1711_v9 = vadd.f32 %v3098_v60, %v1635_v56  ;;  %v1637_v40 = vadd.f32 %v1573_v0, %v1495_v39  ;;  %v1497_v41 = vpop.f32.mrb[27].mxu1 }
 0x24b   : > { %v1712_v53 = vadd.f32 %v3103_v17, %v1636_v38  ;;  %v1638_v62 = vadd.f32 %v1574_v63, %v1497_v41 }
 0x24c   : > { %1775 = vst [vmem:[%s3111_s21 + $0x1c0] sm:$0xff] %v1711_v9  ;;  %v1713_v42 = vadd.f32 %v3098_v60, %v1637_v40 }
 0x24d   : > { %1776 = vst [vmem:[%s3111_s21 + $0x1c8] sm:$0xff] %v1712_v53  ;;  %v1714_v43 = vadd.f32 %v3103_v17, %v1638_v62 }
 0x24e   : > { %1777 = vst [vmem:[%s3111_s21 + $0x1d0] sm:$0xff] %v1713_v42 }
 0x24f   : > { %1778 = vst [vmem:[%s3111_s21 + $0x1d8] sm:$0xff] %v1714_v43 }
 0x252   : > { %v1421_v24 = vpop.f32.mrb[28].mxu0 }
 0x253   : > { %v1607_v47 = vadd.f32 %v1543_v50, %v1421_v24  ;;  %v1423_v3 = vpop.f32.mrb[29].mxu0 }
 0x254   : > { %v1608_v37 = vadd.f32 %v1544_v35, %v1423_v3  ;;  %v1425_v46 = vpop.f32.mrb[30].mxu0 }
 0x255   : > { %v1683_v58 = vadd.f32 %v3098_v60, %v1607_v47  ;;  %v1609_v52 = vadd.f32 %v1545_v31, %v1425_v46  ;;  %v1427_v5 = vpop.f32.mrb[31].mxu0 }
 0x256   : > { %v1684_v25 = vadd.f32 %v3103_v17, %v1608_v37  ;;  %v1610_v14 = vadd.f32 %v1546_v36, %v1427_v5  ;;  %v1501_v13 = vpop.f32.mrb[28].mxu1 }
 0x257   : > { %1747 = vst [vmem:[%s3111_s21 + $0xe0] sm:$0xff] %v1683_v58  ;;  %v1685_v51 = vadd.f32 %v3098_v60, %v1609_v52  ;;  %v1639_v15 = vadd.f32 %v1575_v19, %v1501_v13  ;;  %v1503_v23 = vpop.f32.mrb[29].mxu1 }
 0x258   : > { %1748 = vst [vmem:[%s3111_s21 + $0xe8] sm:$0xff] %v1684_v25  ;;  %v1686_v26 = vadd.f32 %v3103_v17, %v1610_v14  ;;  %v1640_v18 = vadd.f32 %v1576_v7, %v1503_v23  ;;  %v1505_v27 = vpop.f32.mrb[30].mxu1 }
 0x259   : > { %1749 = vst [vmem:[%s3111_s21 + $0xf0] sm:$0xff] %v1685_v51  ;;  %v1715_v61 = vadd.f32 %v3098_v60, %v1639_v15  ;;  %v1641_v54 = vadd.f32 %v1577_v12, %v1505_v27  ;;  %v1507_v20 = vpop.f32.mrb[31].mxu1 }
 0x25a   : > { %1750 = vst [vmem:[%s3111_s21 + $0xf8] sm:$0xff] %v1686_v26  ;;  %v1716_v16 = vadd.f32 %v3103_v17, %v1640_v18  ;;  %v1642_v34 = vadd.f32 %v1578_v28, %v1507_v20 }
 0x25b   : > { %1779 = vst [vmem:[%s3111_s21 + $0x1e0] sm:$0xff] %v1715_v61  ;;  %v1717_v10 = vadd.f32 %v3098_v60, %v1641_v54 }
 0x25c   : > { %1780 = vst [vmem:[%s3111_s21 + $0x1e8] sm:$0xff] %v1716_v16  ;;  %v1718_v21 = vadd.f32 %v3103_v17, %v1642_v34 }
 0x25d   : > { %1781 = vst [vmem:[%s3111_s21 + $0x1f0] sm:$0xff] %v1717_v10 }
 0x25e   : > { %1782 = vst [vmem:[%s3111_s21 + $0x1f8] sm:$0xff] %v1718_v21 }
 0x25f   : > { %2301 = shalt.err (!%p2298_p5)
}
 0x260   : > { %s2302_s29 = scalar_lea.hbm %s3300_s18, 8192  ;;  %s2306_s27 = scalar_lea.hbm %s3359_s4, 16384 }
 0x261   : > { %p2303_p9 = scmp.ne.s32.totalorder %s3300_s18, %s2302_s29  ;;  %p2307_p3 = scmp.lt.u32.totalorder %s3300_s18, %s3359_s4 }
 0x262   : > { %p2308_p7 = scmp.lt.u32.totalorder %s2306_s27, %s2302_s29  ;;  %p2310_p4 = scmp.lt.u32.totalorder %s2302_s29, %s3300_s18 }
 0x263   : > { %p2304_p1 = pnand %p2303_p9, %p2506_p10 }
 0x264   : > { %p2309_p13 = por %p2308_p7, %p2307_p3 }
 0x265   : > { %p2305_p2 = pneg %p2304_p1 }
 0x266   : > { %p2311_p6 = por %p2310_p4, %p2309_p13 }
 0x268   : > { %p2312_p8 = pnand %p2311_p6, %p2305_p2 }
 0x26a   : > { %2315 = shalt.err (!%p2312_p8)
}
 0x26b   : > { %s2383_s22 = smov 256   ;;  %s2384_s13 = smov 16  }
 0x26c   : > { %2004 = dma.vmem_to_hbm [thread:$0]  (%p2506_p10), %s3302_s28, 8192, %s3300_s18, %s1784_s30, %s2383_s22, %s2383_s22, %s2384_s13  }
 0x26d PF: > { %s1815_s24 = sand.u32 1, %s2354_s15   ;;  %p3377_p12 = scmp.ne.s32.totalorder %s3367_s26, 0 }
 0x26e   : > { %p3378_p11 = scmp.ge.s32.totalorder %s2374_s20, 2  ;;  %s1816_s6 = scalar_lea.sflag [#allocation5], %s1815_s24 }
 0x270   : > { %p2015_p0 = pnand %p3378_p11, %p3377_p12 }
 0x272   : > { %2349 = dma.done.wait (!%p2015_p0), %s1816_s6, 8192  }
 0x273   : > { %2351 = vsyncadd (!%p2015_p0), %s1816_s6, 4294959104  ;;  %s21_s20 = sadd.s32 1, %s2374_s20   ;;  %s3379_s15 = smov %s2358_s16 }
 0x274   : > { %p18_p5 = scmp.ge.s32.totalorder %s21_s20, 4   ;;  %s3380_s16 = smov %s2362_s17 }
 0x275   : > { %s3381_s17 = smov %s2515_s10  ;;  %s3382_s18 = smov %s2370_s19 }
 0x276   : > { %s3383_s19 = smov %s3385_s5  ;;  %20 = sbr.rel (!%p18_p5) target bundleno = 7 (0x7), region = 94 }
 0x27d   :  { %1821 = vsyncpa [#allocation4], 1 }
 0x27e   :  { %1823 = vsyncpa [#allocation4 + $0x1], 1 }
 0x27f   :  { %1824 = vsyncpa [#allocation7], 1 }
 0x280   :  { %1825 = vsyncpa [#allocation5], 1 }
 0x281   :  { %1827 = vsyncpa [#allocation5 + $0x1], 1 }

</bundles_post_ra>
